<compile_context>
chip_gen: v7x
topology: tpu7x:2x2x1
jax: 0.10.0
libtpu: 0.0.40
codegen_flags: <defaults>
</compile_context>

<pallas_src>
import functools

import jax
import jax.numpy as jnp
from jax.experimental import pallas as pl
from jax.experimental.pallas import tpu as pltpu


def _mscm_segment_kernel(x_ref, out_ref, corr_ref, *,
                         corr_range, n_segment, height, width, sigma, beta):
    """Processes one temporal segment of one video.

    x_ref    : (n_segment, Cp, Pp) f32  raw frames, spatial dims flattened+padded
    out_ref  : (n_segment, 3,  Pp) f32  channels = [h_motion(dy), v_motion(dx), conf]
    corr_ref : (DDp, Pp) f32 VMEM scratch, packed per-displacement correlations
    """
    R = corr_range
    D = 2 * R + 1
    DD = D * D
    H, W = height, width
    _, _, P = x_ref.shape               # padded lane count (multiple of 128)
    DDp = corr_ref.shape[0]             # DD padded to a multiple of 8
    f32 = jnp.float32

    NEG = f32(-1e30)                    # fill for the padded scratch rows
    inv_D = 1.0 / D
    inv_W = 1.0 / W
    inv_two_sigma2 = 1.0 / (2.0 * sigma * sigma)
    eps = 1e-12 / beta                  # beta folded into the softmax2d epsilon

    # ---------- hoisted, frame-independent index grids (built once) ----------
    # pixel coordinates p -> (y, x), lane-dense (1, P)
    p_f = jax.lax.broadcasted_iota(jnp.int32, (1, P), 1).astype(f32)
    yy = jnp.floor((p_f + 0.5) * inv_W)
    xx = p_f - yy * W
    # displacement coordinates per packed sublane row k, (DDp, P)
    k_f = jax.lax.broadcasted_iota(jnp.int32, (DDp, P), 0).astype(f32)
    dy_grid = jnp.floor((k_f + 0.5) * inv_D)        # i in [0, D)
    dx_grid = k_f - dy_grid * D                     # j in [0, D)
    off_y = dy_grid - R                             # signed dy in [-R, R]
    off_x = dx_grid - R                             # signed dx in [-R, R]
    row_valid = k_f < DD                            # real displacement rows
    row_valid_f = row_valid.astype(f32)
    # out-of-bounds mask (replaces ConstantPad2d zero padding) + pad-row fill
    valid = ((yy + off_y >= 0) & (yy + off_y < H)
             & (xx + off_x >= 0) & (xx + off_x < W) & row_valid)
    fill = jnp.where(row_valid, f32(0.0), NEG)      # OOB -> 0 ; pad rows -> -1e30
    # row selector for assembling the per-frame (3, P) output in one store
    out_row = jax.lax.broadcasted_iota(jnp.int32, (3, P), 0)

    # zero-init the scratch once so its never-written pad rows hold no garbage
    corr_ref[...] = jnp.zeros((DDp, P), f32)

    # Frame 0 of each segment: its "previous" frame is all zeros -> every
    # correlation is 0, hence conf = 0 and both motion expectations are 0.
    out_ref[0, :, :] = jnp.zeros((3, P), f32)

    for t in range(1, n_segment):
        x1 = x_ref[t]                                # current frame, raw (Cp, P)
        x2 = x_ref[t - 1]                            # previous frame, raw (Cp, P)

        # F.normalize(x, p=2, dim=1): 1/max(||x||,1e-12) == rsqrt(max(ss,1e-24))
        inv_n1 = jax.lax.rsqrt(jnp.maximum(
            jnp.sum(x1 * x1, axis=0, keepdims=True), f32(1e-24)))     # (1, P)
        inv_n2 = jax.lax.rsqrt(jnp.maximum(
            jnp.sum(x2 * x2, axis=0, keepdims=True), f32(1e-24)))     # (1, P)
        # Only the rolled operand is materialized normalized; x1's scale is
        # deferred to a single packed (DDp, P) multiply in the epilogue.
        x2n = x2 * inv_n2

        # ---- correlation: (2R+1)^2 shifted windows via lane rolls (XLU) ----
        # corr_raw[k, p] = sum_c x1[c, p] * x2n[c, p + (dy-R)*W + (dx-R)]
        for dy in range(D):
            for dx in range(D):
                off = (dy - R) * W + (dx - R)
                shifted = x2n if off == 0 else pltpu.roll(
                    x2n, shift=(-off) % P, axis=1)
                k = dy * D + dx
                corr_ref[k:k + 1, :] = jnp.sum(x1 * shifted, axis=0,
                                               keepdims=True)

        # ---- packed, sublane-dense epilogue on the (DDp, P) block ----
        # apply deferred inv_n1 scale, OOB zeroing and pad-row fill in one go
        corr = jnp.where(valid, corr_ref[...] * inv_n1, fill)          # (DDp,P)

        # conf = max_k corr_k ; first-argmax k via max + min-of-matching-index
        conf = jnp.max(corr, axis=0, keepdims=True)                    # (1, P)
        kmax = jnp.min(jnp.where(corr == conf, k_f, f32(DDp)),
                       axis=0, keepdims=True)
        dy_max = jnp.floor((kmax + 0.5) * inv_D)
        dx_max = kmax - dy_max * D

        # Gaussian around the argmax: one dense exp on the EUP, pad rows -> 0
        g = jnp.exp(-((dy_grid - dy_max) ** 2 + (dx_grid - dx_max) ** 2)
                    * inv_two_sigma2) * row_valid_f
        wc = g * corr                                                  # (DDp,P)
        total = jnp.sum(wc, axis=0, keepdims=True)
        num_h = jnp.sum(wc * off_y, axis=0, keepdims=True)             # E[dy]
        num_v = jnp.sum(wc * off_x, axis=0, keepdims=True)             # E[dx]
        inv_total = pl.reciprocal(total + eps, approx=True)

        # single lane-dense (3, P) store per frame
        frame_out = jnp.where(out_row == 0, num_h * inv_total,
                              jnp.where(out_row == 1, num_v * inv_total, conf))
        out_ref[t, :, :] = frame_out


def correlation_module_forward(x, *, corr_range=2, n_segment=2,
                               sigma=0.1, beta=10.0):
    """JAX/Pallas equivalent of CorrelationModule.forward. x: (BT, C, H, W)."""
    x = x.astype(jnp.float32)
    bt, c, h, w = x.shape
    assert bt % n_segment == 0, "batch*time must be divisible by n_segment"
    R = corr_range
    D = 2 * R + 1
    DD = D * D
    P = h * w
    n_groups = bt // n_segment

    # Lane/sublane-dense padded layout.  Pad regions MUST be zero-filled so
    # masked (OOB / wrapped) contributions stay finite and exact.
    p_pad = ((P + 127) // 128) * 128
    c_pad = ((c + 7) // 8) * 8
    dd_pad = ((DD + 7) // 8) * 8

    x_flat = x.reshape(bt, c, P)
    if c_pad != c or p_pad != P:
        x_flat = jnp.pad(x_flat, ((0, 0), (0, c_pad - c), (0, p_pad - P)))

    kernel = functools.partial(
        _mscm_segment_kernel, corr_range=R, n_segment=n_segment,
        height=h, width=w, sigma=sigma, beta=beta)

    out_flat = pl.pallas_call(
        kernel,
        out_shape=jax.ShapeDtypeStruct((bt, 3, p_pad), jnp.float32),
        grid_spec=pltpu.PrefetchScalarGridSpec(
            num_scalar_prefetch=0,
            grid=(n_groups,),
            in_specs=[
                pl.BlockSpec((n_segment, c_pad, p_pad), lambda g: (g, 0, 0)),
            ],
            out_specs=pl.BlockSpec((n_segment, 3, p_pad), lambda g: (g, 0, 0)),
            scratch_shapes=[pltpu.VMEM((dd_pad, p_pad), jnp.float32)],
        ),
        compiler_params=pltpu.CompilerParams(
            dimension_semantics=("parallel",),
            vmem_limit_bytes=32 * 1024 * 1024),
    )(x_flat)

    return out_flat[:, :, :P].reshape(bt, 3, h, w)


if __name__ == "__main__":
    # Small deterministic example: 2 videos x n_segment=2 frames, C=4, 16x16.
    corr_range = 2
    n_segment = 2
    bt, c, h, w = 4, 4, 16, 16

    key = jax.random.PRNGKey(0)
    x = jax.random.normal(key, (bt, c, h, w), dtype=jnp.float32)

    fwd = jax.jit(functools.partial(
        correlation_module_forward, corr_range=corr_range, n_segment=n_segment))
    out = fwd(x)
    jax.block_until_ready(out)

    assert out.shape == (bt, 3, h, w), out.shape
    assert bool(jnp.all(jnp.isfinite(out)))
    print("KERNEL_OK")
</pallas_src>

<mosaic_0001>
module attributes {stable_mosaic.version = 11 : i64} {
  func.func @_mscm_segment_kernel(%arg0: i32, %arg1: memref<2x8x256xf32, #tpu.memory_space<vmem>>, %arg2: memref<2x3x256xf32, #tpu.memory_space<vmem>>, %arg3: memref<32x256xf32, #tpu.memory_space<vmem>>) attributes {dimension_semantics = [#tpu.dimension_semantics<parallel>], iteration_bounds = array<i64: 2>, scalar_prefetch = 0 : i64, scratch_operands = 1 : i64, tpu.core_type = #tpu.core_type<tc>, window_params = [{transform_indices = @transform_0, window_bounds = array<i64: 2, 8, 256>}, {transform_indices = @transform_1, window_bounds = array<i64: 2, 3, 256>}]} {
    %0 = tpu.iota {dimensions = array<i32: 1>} : vector<1x256xi32>
    %1 = arith.sitofp %0 : vector<1x256xi32> to vector<1x256xf32>
    %cst = arith.constant 5.000000e-01 : f32
    %2 = vector.broadcast %cst : f32 to vector<1x256xf32>
    %3 = arith.addf %1, %2 : vector<1x256xf32>
    %cst_0 = arith.constant 6.250000e-02 : f32
    %4 = vector.broadcast %cst_0 : f32 to vector<1x256xf32>
    %5 = arith.mulf %3, %4 : vector<1x256xf32>
    %6 = math.floor %5 : vector<1x256xf32>
    %cst_1 = arith.constant 1.600000e+01 : f32
    %7 = vector.broadcast %cst_1 : f32 to vector<1x256xf32>
    %8 = arith.mulf %6, %7 : vector<1x256xf32>
    %9 = arith.subf %1, %8 : vector<1x256xf32>
    %10 = tpu.iota {dimensions = array<i32: 0>} : vector<32x256xi32>
    %11 = arith.sitofp %10 : vector<32x256xi32> to vector<32x256xf32>
    %cst_2 = arith.constant 5.000000e-01 : f32
    %12 = vector.broadcast %cst_2 : f32 to vector<32x256xf32>
    %13 = arith.addf %11, %12 : vector<32x256xf32>
    %cst_3 = arith.constant 2.000000e-01 : f32
    %14 = vector.broadcast %cst_3 : f32 to vector<32x256xf32>
    %15 = arith.mulf %13, %14 : vector<32x256xf32>
    %16 = math.floor %15 : vector<32x256xf32>
    %cst_4 = arith.constant 5.000000e+00 : f32
    %17 = vector.broadcast %cst_4 : f32 to vector<32x256xf32>
    %18 = arith.mulf %16, %17 : vector<32x256xf32>
    %19 = arith.subf %11, %18 : vector<32x256xf32>
    %cst_5 = arith.constant 2.000000e+00 : f32
    %20 = vector.broadcast %cst_5 : f32 to vector<32x256xf32>
    %21 = arith.subf %16, %20 : vector<32x256xf32>
    %cst_6 = arith.constant 2.000000e+00 : f32
    %22 = vector.broadcast %cst_6 : f32 to vector<32x256xf32>
    %23 = arith.subf %19, %22 : vector<32x256xf32>
    %cst_7 = arith.constant 2.500000e+01 : f32
    %24 = vector.broadcast %cst_7 : f32 to vector<32x256xf32>
    %25 = arith.cmpf olt, %11, %24 : vector<32x256xf32>
    %26 = arith.extui %25 : vector<32x256xi1> to vector<32x256xi32>
    %27 = arith.sitofp %26 : vector<32x256xi32> to vector<32x256xf32>
    %28 = vector.broadcast %6 : vector<1x256xf32> to vector<32x256xf32>
    %29 = arith.addf %28, %21 : vector<32x256xf32>
    %cst_8 = arith.constant 0.000000e+00 : f32
    %30 = vector.broadcast %cst_8 : f32 to vector<32x256xf32>
    %31 = arith.cmpf oge, %29, %30 : vector<32x256xf32>
    %32 = vector.broadcast %6 : vector<1x256xf32> to vector<32x256xf32>
    %33 = arith.addf %32, %21 : vector<32x256xf32>
    %cst_9 = arith.constant 1.600000e+01 : f32
    %34 = vector.broadcast %cst_9 : f32 to vector<32x256xf32>
    %35 = arith.cmpf olt, %33, %34 : vector<32x256xf32>
    %36 = arith.andi %31, %35 : vector<32x256xi1>
    %37 = vector.broadcast %9 : vector<1x256xf32> to vector<32x256xf32>
    %38 = arith.addf %37, %23 : vector<32x256xf32>
    %cst_10 = arith.constant 0.000000e+00 : f32
    %39 = vector.broadcast %cst_10 : f32 to vector<32x256xf32>
    %40 = arith.cmpf oge, %38, %39 : vector<32x256xf32>
    %41 = arith.andi %36, %40 : vector<32x256xi1>
    %42 = vector.broadcast %9 : vector<1x256xf32> to vector<32x256xf32>
    %43 = arith.addf %42, %23 : vector<32x256xf32>
    %cst_11 = arith.constant 1.600000e+01 : f32
    %44 = vector.broadcast %cst_11 : f32 to vector<32x256xf32>
    %45 = arith.cmpf olt, %43, %44 : vector<32x256xf32>
    %46 = arith.andi %41, %45 : vector<32x256xi1>
    %47 = arith.andi %46, %25 : vector<32x256xi1>
    %cst_12 = arith.constant 0.000000e+00 : f32
    %cst_13 = arith.constant -1.000000e+30 : f32
    %48 = vector.broadcast %cst_12 : f32 to vector<32x256xf32>
    %49 = vector.broadcast %cst_13 : f32 to vector<32x256xf32>
    %50 = arith.select %25, %48, %49 : vector<32x256xi1>, vector<32x256xf32>
    %51 = tpu.iota {dimensions = array<i32: 0>} : vector<3x256xi32>
    %cst_14 = arith.constant 0.000000e+00 : f32
    %52 = vector.broadcast %cst_14 : f32 to vector<32x256xf32>
    %c0 = arith.constant 0 : index
    %c0_15 = arith.constant 0 : index
    %53 = vector.load %arg3[%c0, %c0_15] : memref<32x256xf32, #tpu.memory_space<vmem>>, vector<32x256xf32>
    tpu.vector_store %arg3[%c0, %c0_15], %52 {strides = array<i32>} : memref<32x256xf32, #tpu.memory_space<vmem>>, vector<32x256xf32>,
    %cst_16 = arith.constant 0.000000e+00 : f32
    %54 = vector.broadcast %cst_16 : f32 to vector<3x256xf32>
    %c0_17 = arith.constant 0 : index
    %c0_18 = arith.constant 0 : index
    %c0_19 = arith.constant 0 : index
    %55 = vector.load %arg2[%c0_17, %c0_18, %c0_19] : memref<2x3x256xf32, #tpu.memory_space<vmem>>, vector<1x3x256xf32>
    %56 = vector.shape_cast %55 : vector<1x3x256xf32> to vector<3x256xf32>
    %57 = vector.shape_cast %54 : vector<3x256xf32> to vector<1x3x256xf32>
    tpu.vector_store %arg2[%c0_17, %c0_18, %c0_19], %57 {strides = array<i32>} : memref<2x3x256xf32, #tpu.memory_space<vmem>>, vector<1x3x256xf32>,
    %c1 = arith.constant 1 : index
    %c0_20 = arith.constant 0 : index
    %c0_21 = arith.constant 0 : index
    %58 = vector.load %arg1[%c1, %c0_20, %c0_21] : memref<2x8x256xf32, #tpu.memory_space<vmem>>, vector<1x8x256xf32>
    %59 = vector.shape_cast %58 : vector<1x8x256xf32> to vector<8x256xf32>
    %c0_22 = arith.constant 0 : index
    %c0_23 = arith.constant 0 : index
    %c0_24 = arith.constant 0 : index
    %60 = vector.load %arg1[%c0_22, %c0_23, %c0_24] : memref<2x8x256xf32, #tpu.memory_space<vmem>>, vector<1x8x256xf32>
    %61 = vector.shape_cast %60 : vector<1x8x256xf32> to vector<8x256xf32>
    %62 = arith.mulf %59, %59 : vector<8x256xf32>
    %cst_25 = arith.constant dense<0.000000e+00> : vector<256xf32>
    %63 = vector.multi_reduction <add>, %62, %cst_25 [0] : vector<8x256xf32> to vector<256xf32>
    %64 = vector.shape_cast %63 : vector<256xf32> to vector<1x256xf32>
    %cst_26 = arith.constant 1.000000e-24 : f32
    %65 = vector.broadcast %cst_26 : f32 to vector<1x256xf32>
    %66 = arith.maximumf %64, %65 : vector<1x256xf32>
    %67 = math.rsqrt %66 : vector<1x256xf32>
    %68 = arith.mulf %61, %61 : vector<8x256xf32>
    %cst_27 = arith.constant dense<0.000000e+00> : vector<256xf32>
    %69 = vector.multi_reduction <add>, %68, %cst_27 [0] : vector<8x256xf32> to vector<256xf32>
    %70 = vector.shape_cast %69 : vector<256xf32> to vector<1x256xf32>
    %cst_28 = arith.constant 1.000000e-24 : f32
    %71 = vector.broadcast %cst_28 : f32 to vector<1x256xf32>
    %72 = arith.maximumf %70, %71 : vector<1x256xf32>
    %73 = math.rsqrt %72 : vector<1x256xf32>
    %74 = vector.broadcast %73 : vector<1x256xf32> to vector<8x256xf32>
    %75 = arith.mulf %61, %74 : vector<8x256xf32>
    %c34_i32 = arith.constant 34 : i32
    %76 = tpu.dynamic_rotate %75 by %c34_i32 dim 1 : vector<8x256xf32>, i32 -> vector<8x256xf32>
    %77 = arith.mulf %59, %76 : vector<8x256xf32>
    %cst_29 = arith.constant dense<0.000000e+00> : vector<256xf32>
    %78 = vector.multi_reduction <add>, %77, %cst_29 [0] : vector<8x256xf32> to vector<256xf32>
    %79 = vector.shape_cast %78 : vector<256xf32> to vector<1x256xf32>
    %c0_30 = arith.constant 0 : index
    %c0_31 = arith.constant 0 : index
    %80 = vector.load %arg3[%c0_30, %c0_31] : memref<32x256xf32, #tpu.memory_space<vmem>>, vector<1x256xf32>
    tpu.vector_store %arg3[%c0_30, %c0_31], %79 {strides = array<i32>} : memref<32x256xf32, #tpu.memory_space<vmem>>, vector<1x256xf32>,
    %c33_i32 = arith.constant 33 : i32
    %81 = tpu.dynamic_rotate %75 by %c33_i32 dim 1 : vector<8x256xf32>, i32 -> vector<8x256xf32>
    %82 = arith.mulf %59, %81 : vector<8x256xf32>
    %cst_32 = arith.constant dense<0.000000e+00> : vector<256xf32>
    %83 = vector.multi_reduction <add>, %82, %cst_32 [0] : vector<8x256xf32> to vector<256xf32>
    %84 = vector.shape_cast %83 : vector<256xf32> to vector<1x256xf32>
    %c1_33 = arith.constant 1 : index
    %c0_34 = arith.constant 0 : index
    %85 = vector.load %arg3[%c1_33, %c0_34] : memref<32x256xf32, #tpu.memory_space<vmem>>, vector<1x256xf32>
    tpu.vector_store %arg3[%c1_33, %c0_34], %84 {strides = array<i32>} : memref<32x256xf32, #tpu.memory_space<vmem>>, vector<1x256xf32>,
    %c32_i32 = arith.constant 32 : i32
    %86 = tpu.dynamic_rotate %75 by %c32_i32 dim 1 : vector<8x256xf32>, i32 -> vector<8x256xf32>
    %87 = arith.mulf %59, %86 : vector<8x256xf32>
    %cst_35 = arith.constant dense<0.000000e+00> : vector<256xf32>
    %88 = vector.multi_reduction <add>, %87, %cst_35 [0] : vector<8x256xf32> to vector<256xf32>
    %89 = vector.shape_cast %88 : vector<256xf32> to vector<1x256xf32>
    %c2 = arith.constant 2 : index
    %c0_36 = arith.constant 0 : index
    %90 = vector.load %arg3[%c2, %c0_36] : memref<32x256xf32, #tpu.memory_space<vmem>>, vector<1x256xf32>
    tpu.vector_store %arg3[%c2, %c0_36], %89 {strides = array<i32>} : memref<32x256xf32, #tpu.memory_space<vmem>>, vector<1x256xf32>,
    %c31_i32 = arith.constant 31 : i32
    %91 = tpu.dynamic_rotate %75 by %c31_i32 dim 1 : vector<8x256xf32>, i32 -> vector<8x256xf32>
    %92 = arith.mulf %59, %91 : vector<8x256xf32>
    %cst_37 = arith.constant dense<0.000000e+00> : vector<256xf32>
    %93 = vector.multi_reduction <add>, %92, %cst_37 [0] : vector<8x256xf32> to vector<256xf32>
    %94 = vector.shape_cast %93 : vector<256xf32> to vector<1x256xf32>
    %c3 = arith.constant 3 : index
    %c0_38 = arith.constant 0 : index
    %95 = vector.load %arg3[%c3, %c0_38] : memref<32x256xf32, #tpu.memory_space<vmem>>, vector<1x256xf32>
    tpu.vector_store %arg3[%c3, %c0_38], %94 {strides = array<i32>} : memref<32x256xf32, #tpu.memory_space<vmem>>, vector<1x256xf32>,
    %c30_i32 = arith.constant 30 : i32
    %96 = tpu.dynamic_rotate %75 by %c30_i32 dim 1 : vector<8x256xf32>, i32 -> vector<8x256xf32>
    %97 = arith.mulf %59, %96 : vector<8x256xf32>
    %cst_39 = arith.constant dense<0.000000e+00> : vector<256xf32>
    %98 = vector.multi_reduction <add>, %97, %cst_39 [0] : vector<8x256xf32> to vector<256xf32>
    %99 = vector.shape_cast %98 : vector<256xf32> to vector<1x256xf32>
    %c4 = arith.constant 4 : index
    %c0_40 = arith.constant 0 : index
    %100 = vector.load %arg3[%c4, %c0_40] : memref<32x256xf32, #tpu.memory_space<vmem>>, vector<1x256xf32>
    tpu.vector_store %arg3[%c4, %c0_40], %99 {strides = array<i32>} : memref<32x256xf32, #tpu.memory_space<vmem>>, vector<1x256xf32>,
    %c18_i32 = arith.constant 18 : i32
    %101 = tpu.dynamic_rotate %75 by %c18_i32 dim 1 : vector<8x256xf32>, i32 -> vector<8x256xf32>
    %102 = arith.mulf %59, %101 : vector<8x256xf32>
    %cst_41 = arith.constant dense<0.000000e+00> : vector<256xf32>
    %103 = vector.multi_reduction <add>, %102, %cst_41 [0] : vector<8x256xf32> to vector<256xf32>
    %104 = vector.shape_cast %103 : vector<256xf32> to vector<1x256xf32>
    %c5 = arith.constant 5 : index
    %c0_42 = arith.constant 0 : index
    %105 = vector.load %arg3[%c5, %c0_42] : memref<32x256xf32, #tpu.memory_space<vmem>>, vector<1x256xf32>
    tpu.vector_store %arg3[%c5, %c0_42], %104 {strides = array<i32>} : memref<32x256xf32, #tpu.memory_space<vmem>>, vector<1x256xf32>,
    %c17_i32 = arith.constant 17 : i32
    %106 = tpu.dynamic_rotate %75 by %c17_i32 dim 1 : vector<8x256xf32>, i32 -> vector<8x256xf32>
    %107 = arith.mulf %59, %106 : vector<8x256xf32>
    %cst_43 = arith.constant dense<0.000000e+00> : vector<256xf32>
    %108 = vector.multi_reduction <add>, %107, %cst_43 [0] : vector<8x256xf32> to vector<256xf32>
    %109 = vector.shape_cast %108 : vector<256xf32> to vector<1x256xf32>
    %c6 = arith.constant 6 : index
    %c0_44 = arith.constant 0 : index
    %110 = vector.load %arg3[%c6, %c0_44] : memref<32x256xf32, #tpu.memory_space<vmem>>, vector<1x256xf32>
    tpu.vector_store %arg3[%c6, %c0_44], %109 {strides = array<i32>} : memref<32x256xf32, #tpu.memory_space<vmem>>, vector<1x256xf32>,
    %c16_i32 = arith.constant 16 : i32
    %111 = tpu.dynamic_rotate %75 by %c16_i32 dim 1 : vector<8x256xf32>, i32 -> vector<8x256xf32>
    %112 = arith.mulf %59, %111 : vector<8x256xf32>
    %cst_45 = arith.constant dense<0.000000e+00> : vector<256xf32>
    %113 = vector.multi_reduction <add>, %112, %cst_45 [0] : vector<8x256xf32> to vector<256xf32>
    %114 = vector.shape_cast %113 : vector<256xf32> to vector<1x256xf32>
    %c7 = arith.constant 7 : index
    %c0_46 = arith.constant 0 : index
    %115 = vector.load %arg3[%c7, %c0_46] : memref<32x256xf32, #tpu.memory_space<vmem>>, vector<1x256xf32>
    tpu.vector_store %arg3[%c7, %c0_46], %114 {strides = array<i32>} : memref<32x256xf32, #tpu.memory_space<vmem>>, vector<1x256xf32>,
    %c15_i32 = arith.constant 15 : i32
    %116 = tpu.dynamic_rotate %75 by %c15_i32 dim 1 : vector<8x256xf32>, i32 -> vector<8x256xf32>
    %117 = arith.mulf %59, %116 : vector<8x256xf32>
    %cst_47 = arith.constant dense<0.000000e+00> : vector<256xf32>
    %118 = vector.multi_reduction <add>, %117, %cst_47 [0] : vector<8x256xf32> to vector<256xf32>
    %119 = vector.shape_cast %118 : vector<256xf32> to vector<1x256xf32>
    %c8 = arith.constant 8 : index
    %c0_48 = arith.constant 0 : index
    %120 = vector.load %arg3[%c8, %c0_48] : memref<32x256xf32, #tpu.memory_space<vmem>>, vector<1x256xf32>
    tpu.vector_store %arg3[%c8, %c0_48], %119 {strides = array<i32>} : memref<32x256xf32, #tpu.memory_space<vmem>>, vector<1x256xf32>,
    %c14_i32 = arith.constant 14 : i32
    %121 = tpu.dynamic_rotate %75 by %c14_i32 dim 1 : vector<8x256xf32>, i32 -> vector<8x256xf32>
    %122 = arith.mulf %59, %121 : vector<8x256xf32>
    %cst_49 = arith.constant dense<0.000000e+00> : vector<256xf32>
    %123 = vector.multi_reduction <add>, %122, %cst_49 [0] : vector<8x256xf32> to vector<256xf32>
    %124 = vector.shape_cast %123 : vector<256xf32> to vector<1x256xf32>
    %c9 = arith.constant 9 : index
    %c0_50 = arith.constant 0 : index
    %125 = vector.load %arg3[%c9, %c0_50] : memref<32x256xf32, #tpu.memory_space<vmem>>, vector<1x256xf32>
    tpu.vector_store %arg3[%c9, %c0_50], %124 {strides = array<i32>} : memref<32x256xf32, #tpu.memory_space<vmem>>, vector<1x256xf32>,
    %c2_i32 = arith.constant 2 : i32
    %126 = tpu.dynamic_rotate %75 by %c2_i32 dim 1 : vector<8x256xf32>, i32 -> vector<8x256xf32>
    %127 = arith.mulf %59, %126 : vector<8x256xf32>
    %cst_51 = arith.constant dense<0.000000e+00> : vector<256xf32>
    %128 = vector.multi_reduction <add>, %127, %cst_51 [0] : vector<8x256xf32> to vector<256xf32>
    %129 = vector.shape_cast %128 : vector<256xf32> to vector<1x256xf32>
    %c10 = arith.constant 10 : index
    %c0_52 = arith.constant 0 : index
    %130 = vector.load %arg3[%c10, %c0_52] : memref<32x256xf32, #tpu.memory_space<vmem>>, vector<1x256xf32>
    tpu.vector_store %arg3[%c10, %c0_52], %129 {strides = array<i32>} : memref<32x256xf32, #tpu.memory_space<vmem>>, vector<1x256xf32>,
    %c1_i32 = arith.constant 1 : i32
    %131 = tpu.dynamic_rotate %75 by %c1_i32 dim 1 : vector<8x256xf32>, i32 -> vector<8x256xf32>
    %132 = arith.mulf %59, %131 : vector<8x256xf32>
    %cst_53 = arith.constant dense<0.000000e+00> : vector<256xf32>
    %133 = vector.multi_reduction <add>, %132, %cst_53 [0] : vector<8x256xf32> to vector<256xf32>
    %134 = vector.shape_cast %133 : vector<256xf32> to vector<1x256xf32>
    %c11 = arith.constant 11 : index
    %c0_54 = arith.constant 0 : index
    %135 = vector.load %arg3[%c11, %c0_54] : memref<32x256xf32, #tpu.memory_space<vmem>>, vector<1x256xf32>
    tpu.vector_store %arg3[%c11, %c0_54], %134 {strides = array<i32>} : memref<32x256xf32, #tpu.memory_space<vmem>>, vector<1x256xf32>,
    %136 = arith.mulf %59, %75 : vector<8x256xf32>
    %cst_55 = arith.constant dense<0.000000e+00> : vector<256xf32>
    %137 = vector.multi_reduction <add>, %136, %cst_55 [0] : vector<8x256xf32> to vector<256xf32>
    %138 = vector.shape_cast %137 : vector<256xf32> to vector<1x256xf32>
    %c12 = arith.constant 12 : index
    %c0_56 = arith.constant 0 : index
    %139 = vector.load %arg3[%c12, %c0_56] : memref<32x256xf32, #tpu.memory_space<vmem>>, vector<1x256xf32>
    tpu.vector_store %arg3[%c12, %c0_56], %138 {strides = array<i32>} : memref<32x256xf32, #tpu.memory_space<vmem>>, vector<1x256xf32>,
    %c255_i32 = arith.constant 255 : i32
    %140 = tpu.dynamic_rotate %75 by %c255_i32 dim 1 : vector<8x256xf32>, i32 -> vector<8x256xf32>
    %141 = arith.mulf %59, %140 : vector<8x256xf32>
    %cst_57 = arith.constant dense<0.000000e+00> : vector<256xf32>
    %142 = vector.multi_reduction <add>, %141, %cst_57 [0] : vector<8x256xf32> to vector<256xf32>
    %143 = vector.shape_cast %142 : vector<256xf32> to vector<1x256xf32>
    %c13 = arith.constant 13 : index
    %c0_58 = arith.constant 0 : index
    %144 = vector.load %arg3[%c13, %c0_58] : memref<32x256xf32, #tpu.memory_space<vmem>>, vector<1x256xf32>
    tpu.vector_store %arg3[%c13, %c0_58], %143 {strides = array<i32>} : memref<32x256xf32, #tpu.memory_space<vmem>>, vector<1x256xf32>,
    %c254_i32 = arith.constant 254 : i32
    %145 = tpu.dynamic_rotate %75 by %c254_i32 dim 1 : vector<8x256xf32>, i32 -> vector<8x256xf32>
    %146 = arith.mulf %59, %145 : vector<8x256xf32>
    %cst_59 = arith.constant dense<0.000000e+00> : vector<256xf32>
    %147 = vector.multi_reduction <add>, %146, %cst_59 [0] : vector<8x256xf32> to vector<256xf32>
    %148 = vector.shape_cast %147 : vector<256xf32> to vector<1x256xf32>
    %c14 = arith.constant 14 : index
    %c0_60 = arith.constant 0 : index
    %149 = vector.load %arg3[%c14, %c0_60] : memref<32x256xf32, #tpu.memory_space<vmem>>, vector<1x256xf32>
    tpu.vector_store %arg3[%c14, %c0_60], %148 {strides = array<i32>} : memref<32x256xf32, #tpu.memory_space<vmem>>, vector<1x256xf32>,
    %c242_i32 = arith.constant 242 : i32
    %150 = tpu.dynamic_rotate %75 by %c242_i32 dim 1 : vector<8x256xf32>, i32 -> vector<8x256xf32>
    %151 = arith.mulf %59, %150 : vector<8x256xf32>
    %cst_61 = arith.constant dense<0.000000e+00> : vector<256xf32>
    %152 = vector.multi_reduction <add>, %151, %cst_61 [0] : vector<8x256xf32> to vector<256xf32>
    %153 = vector.shape_cast %152 : vector<256xf32> to vector<1x256xf32>
    %c15 = arith.constant 15 : index
    %c0_62 = arith.constant 0 : index
    %154 = vector.load %arg3[%c15, %c0_62] : memref<32x256xf32, #tpu.memory_space<vmem>>, vector<1x256xf32>
    tpu.vector_store %arg3[%c15, %c0_62], %153 {strides = array<i32>} : memref<32x256xf32, #tpu.memory_space<vmem>>, vector<1x256xf32>,
    %c241_i32 = arith.constant 241 : i32
    %155 = tpu.dynamic_rotate %75 by %c241_i32 dim 1 : vector<8x256xf32>, i32 -> vector<8x256xf32>
    %156 = arith.mulf %59, %155 : vector<8x256xf32>
    %cst_63 = arith.constant dense<0.000000e+00> : vector<256xf32>
    %157 = vector.multi_reduction <add>, %156, %cst_63 [0] : vector<8x256xf32> to vector<256xf32>
    %158 = vector.shape_cast %157 : vector<256xf32> to vector<1x256xf32>
    %c16 = arith.constant 16 : index
    %c0_64 = arith.constant 0 : index
    %159 = vector.load %arg3[%c16, %c0_64] : memref<32x256xf32, #tpu.memory_space<vmem>>, vector<1x256xf32>
    tpu.vector_store %arg3[%c16, %c0_64], %158 {strides = array<i32>} : memref<32x256xf32, #tpu.memory_space<vmem>>, vector<1x256xf32>,
    %c240_i32 = arith.constant 240 : i32
    %160 = tpu.dynamic_rotate %75 by %c240_i32 dim 1 : vector<8x256xf32>, i32 -> vector<8x256xf32>
    %161 = arith.mulf %59, %160 : vector<8x256xf32>
    %cst_65 = arith.constant dense<0.000000e+00> : vector<256xf32>
    %162 = vector.multi_reduction <add>, %161, %cst_65 [0] : vector<8x256xf32> to vector<256xf32>
    %163 = vector.shape_cast %162 : vector<256xf32> to vector<1x256xf32>
    %c17 = arith.constant 17 : index
    %c0_66 = arith.constant 0 : index
    %164 = vector.load %arg3[%c17, %c0_66] : memref<32x256xf32, #tpu.memory_space<vmem>>, vector<1x256xf32>
    tpu.vector_store %arg3[%c17, %c0_66], %163 {strides = array<i32>} : memref<32x256xf32, #tpu.memory_space<vmem>>, vector<1x256xf32>,
    %c239_i32 = arith.constant 239 : i32
    %165 = tpu.dynamic_rotate %75 by %c239_i32 dim 1 : vector<8x256xf32>, i32 -> vector<8x256xf32>
    %166 = arith.mulf %59, %165 : vector<8x256xf32>
    %cst_67 = arith.constant dense<0.000000e+00> : vector<256xf32>
    %167 = vector.multi_reduction <add>, %166, %cst_67 [0] : vector<8x256xf32> to vector<256xf32>
    %168 = vector.shape_cast %167 : vector<256xf32> to vector<1x256xf32>
    %c18 = arith.constant 18 : index
    %c0_68 = arith.constant 0 : index
    %169 = vector.load %arg3[%c18, %c0_68] : memref<32x256xf32, #tpu.memory_space<vmem>>, vector<1x256xf32>
    tpu.vector_store %arg3[%c18, %c0_68], %168 {strides = array<i32>} : memref<32x256xf32, #tpu.memory_space<vmem>>, vector<1x256xf32>,
    %c238_i32 = arith.constant 238 : i32
    %170 = tpu.dynamic_rotate %75 by %c238_i32 dim 1 : vector<8x256xf32>, i32 -> vector<8x256xf32>
    %171 = arith.mulf %59, %170 : vector<8x256xf32>
    %cst_69 = arith.constant dense<0.000000e+00> : vector<256xf32>
    %172 = vector.multi_reduction <add>, %171, %cst_69 [0] : vector<8x256xf32> to vector<256xf32>
    %173 = vector.shape_cast %172 : vector<256xf32> to vector<1x256xf32>
    %c19 = arith.constant 19 : index
    %c0_70 = arith.constant 0 : index
    %174 = vector.load %arg3[%c19, %c0_70] : memref<32x256xf32, #tpu.memory_space<vmem>>, vector<1x256xf32>
    tpu.vector_store %arg3[%c19, %c0_70], %173 {strides = array<i32>} : memref<32x256xf32, #tpu.memory_space<vmem>>, vector<1x256xf32>,
    %c226_i32 = arith.constant 226 : i32
    %175 = tpu.dynamic_rotate %75 by %c226_i32 dim 1 : vector<8x256xf32>, i32 -> vector<8x256xf32>
    %176 = arith.mulf %59, %175 : vector<8x256xf32>
    %cst_71 = arith.constant dense<0.000000e+00> : vector<256xf32>
    %177 = vector.multi_reduction <add>, %176, %cst_71 [0] : vector<8x256xf32> to vector<256xf32>
    %178 = vector.shape_cast %177 : vector<256xf32> to vector<1x256xf32>
    %c20 = arith.constant 20 : index
    %c0_72 = arith.constant 0 : index
    %179 = vector.load %arg3[%c20, %c0_72] : memref<32x256xf32, #tpu.memory_space<vmem>>, vector<1x256xf32>
    tpu.vector_store %arg3[%c20, %c0_72], %178 {strides = array<i32>} : memref<32x256xf32, #tpu.memory_space<vmem>>, vector<1x256xf32>,
    %c225_i32 = arith.constant 225 : i32
    %180 = tpu.dynamic_rotate %75 by %c225_i32 dim 1 : vector<8x256xf32>, i32 -> vector<8x256xf32>
    %181 = arith.mulf %59, %180 : vector<8x256xf32>
    %cst_73 = arith.constant dense<0.000000e+00> : vector<256xf32>
    %182 = vector.multi_reduction <add>, %181, %cst_73 [0] : vector<8x256xf32> to vector<256xf32>
    %183 = vector.shape_cast %182 : vector<256xf32> to vector<1x256xf32>
    %c21 = arith.constant 21 : index
    %c0_74 = arith.constant 0 : index
    %184 = vector.load %arg3[%c21, %c0_74] : memref<32x256xf32, #tpu.memory_space<vmem>>, vector<1x256xf32>
    tpu.vector_store %arg3[%c21, %c0_74], %183 {strides = array<i32>} : memref<32x256xf32, #tpu.memory_space<vmem>>, vector<1x256xf32>,
    %c224_i32 = arith.constant 224 : i32
    %185 = tpu.dynamic_rotate %75 by %c224_i32 dim 1 : vector<8x256xf32>, i32 -> vector<8x256xf32>
    %186 = arith.mulf %59, %185 : vector<8x256xf32>
    %cst_75 = arith.constant dense<0.000000e+00> : vector<256xf32>
    %187 = vector.multi_reduction <add>, %186, %cst_75 [0] : vector<8x256xf32> to vector<256xf32>
    %188 = vector.shape_cast %187 : vector<256xf32> to vector<1x256xf32>
    %c22 = arith.constant 22 : index
    %c0_76 = arith.constant 0 : index
    %189 = vector.load %arg3[%c22, %c0_76] : memref<32x256xf32, #tpu.memory_space<vmem>>, vector<1x256xf32>
    tpu.vector_store %arg3[%c22, %c0_76], %188 {strides = array<i32>} : memref<32x256xf32, #tpu.memory_space<vmem>>, vector<1x256xf32>,
    %c223_i32 = arith.constant 223 : i32
    %190 = tpu.dynamic_rotate %75 by %c223_i32 dim 1 : vector<8x256xf32>, i32 -> vector<8x256xf32>
    %191 = arith.mulf %59, %190 : vector<8x256xf32>
    %cst_77 = arith.constant dense<0.000000e+00> : vector<256xf32>
    %192 = vector.multi_reduction <add>, %191, %cst_77 [0] : vector<8x256xf32> to vector<256xf32>
    %193 = vector.shape_cast %192 : vector<256xf32> to vector<1x256xf32>
    %c23 = arith.constant 23 : index
    %c0_78 = arith.constant 0 : index
    %194 = vector.load %arg3[%c23, %c0_78] : memref<32x256xf32, #tpu.memory_space<vmem>>, vector<1x256xf32>
    tpu.vector_store %arg3[%c23, %c0_78], %193 {strides = array<i32>} : memref<32x256xf32, #tpu.memory_space<vmem>>, vector<1x256xf32>,
    %c222_i32 = arith.constant 222 : i32
    %195 = tpu.dynamic_rotate %75 by %c222_i32 dim 1 : vector<8x256xf32>, i32 -> vector<8x256xf32>
    %196 = arith.mulf %59, %195 : vector<8x256xf32>
    %cst_79 = arith.constant dense<0.000000e+00> : vector<256xf32>
    %197 = vector.multi_reduction <add>, %196, %cst_79 [0] : vector<8x256xf32> to vector<256xf32>
    %198 = vector.shape_cast %197 : vector<256xf32> to vector<1x256xf32>
    %c24 = arith.constant 24 : index
    %c0_80 = arith.constant 0 : index
    %199 = vector.load %arg3[%c24, %c0_80] : memref<32x256xf32, #tpu.memory_space<vmem>>, vector<1x256xf32>
    tpu.vector_store %arg3[%c24, %c0_80], %198 {strides = array<i32>} : memref<32x256xf32, #tpu.memory_space<vmem>>, vector<1x256xf32>,
    %c0_81 = arith.constant 0 : index
    %c0_82 = arith.constant 0 : index
    %200 = vector.load %arg3[%c0_81, %c0_82] : memref<32x256xf32, #tpu.memory_space<vmem>>, vector<32x256xf32>
    %201 = vector.broadcast %67 : vector<1x256xf32> to vector<32x256xf32>
    %202 = arith.mulf %200, %201 : vector<32x256xf32>
    %203 = arith.select %47, %202, %50 : vector<32x256xi1>, vector<32x256xf32>
    %cst_83 = arith.constant dense<0xFF800000> : vector<256xf32>
    %204 = vector.multi_reduction <maximumf>, %203, %cst_83 [0] : vector<32x256xf32> to vector<256xf32>
    %205 = vector.shape_cast %204 : vector<256xf32> to vector<1x256xf32>
    %206 = vector.broadcast %205 : vector<1x256xf32> to vector<32x256xf32>
    %207 = arith.cmpf oeq, %203, %206 : vector<32x256xf32>
    %cst_84 = arith.constant 3.200000e+01 : f32
    %208 = vector.broadcast %cst_84 : f32 to vector<32x256xf32>
    %209 = arith.select %207, %11, %208 : vector<32x256xi1>, vector<32x256xf32>
    %cst_85 = arith.constant dense<0x7F800000> : vector<256xf32>
    %210 = vector.multi_reduction <minimumf>, %209, %cst_85 [0] : vector<32x256xf32> to vector<256xf32>
    %211 = vector.shape_cast %210 : vector<256xf32> to vector<1x256xf32>
    %cst_86 = arith.constant 5.000000e-01 : f32
    %212 = vector.broadcast %cst_86 : f32 to vector<1x256xf32>
    %213 = arith.addf %211, %212 : vector<1x256xf32>
    %cst_87 = arith.constant 2.000000e-01 : f32
    %214 = vector.broadcast %cst_87 : f32 to vector<1x256xf32>
    %215 = arith.mulf %213, %214 : vector<1x256xf32>
    %216 = math.floor %215 : vector<1x256xf32>
    %cst_88 = arith.constant 5.000000e+00 : f32
    %217 = vector.broadcast %cst_88 : f32 to vector<1x256xf32>
    %218 = arith.mulf %216, %217 : vector<1x256xf32>
    %219 = arith.subf %211, %218 : vector<1x256xf32>
    %220 = vector.broadcast %216 : vector<1x256xf32> to vector<32x256xf32>
    %221 = arith.subf %16, %220 : vector<32x256xf32>
    %222 = arith.mulf %221, %221 : vector<32x256xf32>
    %223 = vector.broadcast %219 : vector<1x256xf32> to vector<32x256xf32>
    %224 = arith.subf %19, %223 : vector<32x256xf32>
    %225 = arith.mulf %224, %224 : vector<32x256xf32>
    %226 = arith.addf %222, %225 : vector<32x256xf32>
    %cst_89 = arith.constant 0.000000e+00 : f32
    %227 = vector.broadcast %cst_89 : f32 to vector<32x256xf32>
    %228 = arith.subf %227, %226 : vector<32x256xf32>
    %cst_90 = arith.constant 5.000000e+01 : f32
    %229 = vector.broadcast %cst_90 : f32 to vector<32x256xf32>
    %230 = arith.mulf %228, %229 : vector<32x256xf32>
    %231 = math.exp %230 : vector<32x256xf32>
    %232 = arith.mulf %231, %27 : vector<32x256xf32>
    %233 = arith.mulf %232, %203 : vector<32x256xf32>
    %cst_91 = arith.constant dense<0.000000e+00> : vector<256xf32>
    %234 = vector.multi_reduction <add>, %233, %cst_91 [0] : vector<32x256xf32> to vector<256xf32>
    %235 = vector.shape_cast %234 : vector<256xf32> to vector<1x256xf32>
    %236 = arith.mulf %233, %21 : vector<32x256xf32>
    %cst_92 = arith.constant dense<0.000000e+00> : vector<256xf32>
    %237 = vector.multi_reduction <add>, %236, %cst_92 [0] : vector<32x256xf32> to vector<256xf32>
    %238 = vector.shape_cast %237 : vector<256xf32> to vector<1x256xf32>
    %239 = arith.mulf %233, %23 : vector<32x256xf32>
    %cst_93 = arith.constant dense<0.000000e+00> : vector<256xf32>
    %240 = vector.multi_reduction <add>, %239, %cst_93 [0] : vector<32x256xf32> to vector<256xf32>
    %241 = vector.shape_cast %240 : vector<256xf32> to vector<1x256xf32>
    %cst_94 = arith.constant 9.99999982E-14 : f32
    %242 = vector.broadcast %cst_94 : f32 to vector<1x256xf32>
    %243 = arith.addf %235, %242 : vector<1x256xf32>
    %244 = tpu.reciprocal %243 {approx = true} : vector<1x256xf32> -> vector<1x256xf32>
    %c0_i32 = arith.constant 0 : i32
    %245 = vector.broadcast %c0_i32 : i32 to vector<3x256xi32>
    %246 = arith.cmpi eq, %51, %245 : vector<3x256xi32>
    %247 = arith.mulf %238, %244 : vector<1x256xf32>
    %c1_i32_95 = arith.constant 1 : i32
    %248 = vector.broadcast %c1_i32_95 : i32 to vector<3x256xi32>
    %249 = arith.cmpi eq, %51, %248 : vector<3x256xi32>
    %250 = arith.mulf %241, %244 : vector<1x256xf32>
    %251 = vector.shape_cast %250 : vector<1x256xf32> to vector<1x256xf32>
    %252 = vector.broadcast %251 : vector<1x256xf32> to vector<3x256xf32>
    %253 = vector.shape_cast %205 : vector<1x256xf32> to vector<1x256xf32>
    %254 = vector.broadcast %253 : vector<1x256xf32> to vector<3x256xf32>
    %255 = arith.select %249, %252, %254 : vector<3x256xi1>, vector<3x256xf32>
    %256 = vector.shape_cast %247 : vector<1x256xf32> to vector<1x256xf32>
    %257 = vector.broadcast %256 : vector<1x256xf32> to vector<3x256xf32>
    %258 = arith.select %246, %257, %255 : vector<3x256xi1>, vector<3x256xf32>
    %c1_96 = arith.constant 1 : index
    %c0_97 = arith.constant 0 : index
    %c0_98 = arith.constant 0 : index
    %259 = vector.load %arg2[%c1_96, %c0_97, %c0_98] : memref<2x3x256xf32, #tpu.memory_space<vmem>>, vector<1x3x256xf32>
    %260 = vector.shape_cast %259 : vector<1x3x256xf32> to vector<3x256xf32>
    %261 = vector.shape_cast %258 : vector<3x256xf32> to vector<1x3x256xf32>
    tpu.vector_store %arg2[%c1_96, %c0_97, %c0_98], %261 {strides = array<i32>} : memref<2x3x256xf32, #tpu.memory_space<vmem>>, vector<1x3x256xf32>,
    return
  }
  func.func @transform_0(%arg0: i32) -> (i32, i32, i32) {
    %c0_i32 = arith.constant 0 : i32
    %c0_i32_0 = arith.constant 0 : i32
    %c0_i32_1 = arith.constant 0 : i32
    return %arg0, %c0_i32, %c0_i32_0 : i32, i32, i32
  }
  func.func @transform_1(%arg0: i32) -> (i32, i32, i32) {
    %c0_i32 = arith.constant 0 : i32
    %c0_i32_0 = arith.constant 0 : i32
    %c0_i32_1 = arith.constant 0 : i32
    return %arg0, %c0_i32, %c0_i32_0 : i32, i32, i32
  }
}

</mosaic_0001>

<bundles_post_ra>
// kernel: correlation_module_forward.1
= control target key start
LH: loop header
LB: loop body
LE: loop exit
PB: predicated region body
PF: predicated region fallthrough
CT: control target
= control target key end

     0   :  { %s1833_s6 = smov 0   ;;  %s2635_s0 = inlined_call_operand.vmem [shape: f32[4,8,256], index: 0, kind: input, shape index: {}]   ;;  %s2636_s1 = inlined_call_operand.vmem [shape: f32[4,3,256], index: 1, kind: output, shape index: {}]  }
   0x1 LB: > { %s1693_s7 = sadd.s32 4294967295, %s1794_s6   ;;  %p1697_p0 = scmp.ge.s32.totalorder %s1794_s6, 1  ;;  %s1794_s6 = sphi %s1833_s6, %s11_s6  }
   0x2   : > { %p89_p1 = scmp.lt.s32.totalorder %s1794_s6, 3 }
   0x4   : > { %p90_p2 = pnand %p1697_p0, %p89_p1 }
   0x5   : > { %s1698_s8 = sshll.u32 (!%p90_p2), %s1693_s7, 1  ;;  %v1796_v18 = vmov (!%p90_p2), 0.0   ;;  %s1797_s13 = smov (!%p90_p2), 33   ;;  %v1812_v31 = vmov (!%p90_p2), 1966171168   ;;  %v125_v35 = vlaneseq (!%p90_p2)  ;;  %v2639_v48 = vmov (!%p90_p2), 0 }
   0x6   : > { %93 = sbr.rel (%p90_p2) target bundleno = 431 (0x1af), region = 24  ;;  %p112_p3 = scmp.lt.s32.totalorder (!%p90_p2), %s1698_s8, 3  ;;  %273 = vst [vmem:[#allocation2] sm:$0xff] (!%p90_p2), %v1796_v18  ;;  %274 = vst [vmem:[#allocation2 + $0x8] sm:$0xff] (!%p90_p2), %v1796_v18  ;;  %v350_v32 = vunpack.c.l.s4 (!%p90_p2), %v1812_v31 }
   0x7   : > { %275 = vst [vmem:[#allocation2 + $0x10] sm:$0xff] (!%p90_p2), %v1796_v18  ;;  %276 = vst [vmem:[#allocation2 + $0x18] sm:$0xff] (!%p90_p2), %v1796_v18  ;;  %s1798_s14 = smov (!%p90_p2), 34   ;;  %s1799_s15 = smov (!%p90_p2), 32   ;;  %v1905_v38 = vshrl.u32 (!%p90_p2), %v125_v35, 7  ;;  %vm1916_vm0 = vcmp.lt.s32.totalorder (!%p90_p2), %v125_v35, 256 }
   0x8   : > { %277 = vst [vmem:[#allocation2 + $0x20] sm:$0xff] (!%p90_p2), %v1796_v18  ;;  %278 = vst [vmem:[#allocation2 + $0x28] sm:$0xff] (!%p90_p2), %v1796_v18  ;;  %s1800_s16 = smov (!%p90_p2), 31   ;;  %s1801_s17 = smov (!%p90_p2), 30   ;;  %v351_v39 = vunpack.c.0.s8 (!%p90_p2), %v350_v32  ;;  %v2640_v48 = vsel (!%p90_p2), %vm1916_vm0, 4294967295, %v2639_v48  ;;  %v1939_v51 = vand.u32 (!%p90_p2), 127, %v125_v35 }
   0x9   : > { %279 = vst [vmem:[#allocation2 + $0x30] sm:$0xff] (!%p90_p2), %v1796_v18  ;;  %280 = vst [vmem:[#allocation2 + $0x38] sm:$0xff] (!%p90_p2), %v1796_v18  ;;  %s1802_s18 = smov (!%p90_p2), 18   ;;  %s1803_s19 = smov (!%p90_p2), 17   ;;  %v1935_v49 = vcvt.s32.f32 (!%p90_p2), %v1905_v38 }
   0xa   : > { %s1804_s20 = smov (!%p90_p2), 16   ;;  %s1805_s21 = smov (!%p90_p2), 15   ;;  %v1910_v44 = vsub.s32 (!%p90_p2), %v351_v39, %v1905_v38  ;;  %v1944_v53 = vadd.s32 (!%p90_p2), 128, %v1939_v51  ;;  %v128_v54 = vcvt.s32.f32 (!%p90_p2), %v1939_v51  ;;  %vm374_vm1 = vcmp.lt.s32.totalorder (!%p90_p2), %v1939_v51, 33 }
   0xb   : > { %s1806_s22 = smov (!%p90_p2), 14   ;;  %s1807_s23 = smov (!%p90_p2), 2   ;;  %v149_v55 = vadd.f32 (!%p90_p2), 0.5, %v1935_v49  ;;  %vm329_vm2 = vcmp.lt.s32.totalorder (!%p90_p2), %v1939_v51, 34  ;;  %vm416_vm3 = vcmp.lt.s32.totalorder (!%p90_p2), %v1939_v51, 32  ;;  %vm458_vm4 = vcmp.lt.s32.totalorder (!%p90_p2), %v1939_v51, 31 }
   0xc   : > { %s1808_s24 = smov (!%p90_p2), 1   ;;  %s1809_s25 = smov (!%p90_p2), 127   ;;  %v129_v58 = vcvt.s32.f32 (!%p90_p2), %v1944_v53  ;;  %v130_v59 = vadd.f32 (!%p90_p2), 0.5, %v128_v54  ;;  %vm500_vm5 = vcmp.lt.s32.totalorder (!%p90_p2), %v1939_v51, 30  ;;  %vm542_vm6 = vcmp.lt.s32.totalorder (!%p90_p2), %v1939_v51, 18 }
   0xd   : > { %s2696_s8 = smov (!%p112_p3, %s1698_s8), 3  ;;  %s1810_s26 = smov 126   ;;  %v153_v60 = vmul.f32 0.2, %v149_v55  ;;  %vm584_vm7 = vcmp.lt.s32.totalorder %v1939_v51, 17  ;;  %vm626_vm8 = vcmp.lt.s32.totalorder %v1939_v51, 16 }
   0xe   : > { %s1721_s9 = sshll.u32 %s2696_s8, 4  ;;  %s1811_s27 = smov 114   ;;  %v131_v63 = vadd.f32 0.5, %v129_v58  ;;  %vm668_vm9 = vcmp.lt.s32.totalorder %v1939_v51, 15  ;;  %vm710_vm10 = vcmp.lt.s32.totalorder %v1939_v51, 14  ;;  %vm752_vm11 = vcmp.lt.s32.totalorder %v1939_v51, 2 }
   0xf   : > { %s1847_s12 = scalar_lea.vmem %s2635_s0, %s1721_s9  ;;  %s1813_s28 = smov 113   ;;  %vm794_vm12 = vcmp.lt.s32.totalorder %v1939_v51, 1  ;;  %vm871_vm13 = vcmp.lt.s32.totalorder %v1939_v51, 127  ;;  %vm913_vm14 = vcmp.lt.s32.totalorder %v1939_v51, 126  ;;  %vm955_vm15 = vcmp.lt.s32.totalorder %v1939_v51, 114 }
  0x10   : > { %v285_v0 = vld [vmem:[%s1847_s12] sm:$0xff]  ;;  %v286_v1 = vld [vmem:[%s1847_s12 + $0x8] sm:$0xff]  ;;  %v1890_v23 = vld [vmem:[%s1847_s12 + $0x10] sm:$0xff]  ;;  %s1814_s29 = smov 112   ;;  %s1815_s30 = smov 111  }
  0x11   : > { %v305_v2 = vmul.f32 %v285_v0, %v285_v0  ;;  %v306_v3 = vmul.f32 %v286_v1, %v286_v1  ;;  %v1893_v24 = vld [vmem:[%s1847_s12 + $0x18] sm:$0xff]  ;;  %s1816_s2 = smov 110   ;;  %s1817_s3 = smov 98   ;;  %v287_v50 = vmul.f32 %v1890_v23, %v1890_v23 }
  0x12   : > { %s1818_s4 = smov 97   ;;  %s1819_s5 = smov 96   ;;  %v288_v52 = vmul.f32 %v1893_v24, %v1893_v24 }
  0x13   : > { %v307_v4 = vrot.slane %v305_v2, 4  ;;  %v313_v5 = vrot.slane %v306_v3, 4  ;;  %s1820_s7 = smov 95   ;;  %s1821_s9 = smov 94   ;;  %v289_v56 = vrot.slane %v287_v50, 4 }
  0x14   : > { %v295_v57 = vrot.slane %v288_v52, 4  ;;  %s1722_s10 = sshll.u32 %s2696_s8, 3 }
  0x15   : > { %v308_v6 = vadd.f32 %v307_v4, %v305_v2  ;;  %v314_v7 = vadd.f32 %v313_v5, %v306_v3  ;;  %v290_v61 = vadd.f32 %v289_v56, %v287_v50  ;;  %v142_v4 = vadd.s32 8, %v1905_v38 }
  0x16   : > { %v296_v62 = vadd.f32 %v295_v57, %v288_v52  ;;  %v133_v5 = vmul.f32 0.0625, %v131_v63 }
  0x17   : > { %v309_v8 = vrot.slane %v308_v6, 2  ;;  %v315_v9 = vrot.slane %v314_v7, 2  ;;  %v291_v2 = vrot.slane %v290_v61, 2 }
  0x18   : > { %v297_v3 = vrot.slane %v296_v62, 2 }
  0x19   : > { %v310_v10 = vadd.f32 %v309_v8, %v308_v6  ;;  %v316_v11 = vadd.f32 %v315_v9, %v314_v7  ;;  %v292_v8 = vadd.f32 %v291_v2, %v290_v61 }
  0x1a   : > { %v298_v9 = vadd.f32 %v297_v3, %v296_v62 }
  0x1b   : > { %v311_v12 = vrot.slane %v310_v10, 1  ;;  %v317_v13 = vrot.slane %v316_v11, 1 }
  0x1d   : > { %v312_v14 = vadd.f32 %v311_v12, %v310_v10  ;;  %v318_v15 = vadd.f32 %v317_v13, %v316_v11  ;;  %v1955_v10 = vcvt.s32.f32 %v142_v4  ;;  %v1957_v13 = vfloor.f32 %v133_v5 }
  0x1f   : > { %v319_v16 = vmax.f32 %v312_v14, 1e-24  ;;  %v320_v17 = vmax.f32 %v318_v15, 1e-24 }
  0x21   : > { %1758 = vrsqrt.f32 %v319_v16  ;;  %v293_v16 = vrot.slane %v292_v8, 1 }
  0x22   : > { %1760 = vrsqrt.f32 %v320_v17 }
  0x2b   : > { %v1759_v19 = vpop.eup %1758 }
  0x2c   : > { %v1761_v20 = vpop.eup %1760  ;;  %v1859_v21 = vmul.f32 %v1759_v19, %v285_v0  ;;  %v132_v0 = vmul.f32 0.0625, %v130_v59  ;;  %v299_v19 = vrot.slane %v298_v9, 1 }
  0x2d   : > { %v1863_v22 = vmul.f32 %v1761_v20, %v286_v1  ;;  %v1949_v1 = vfloor.f32 %v153_v60  ;;  %v150_v20 = vadd.f32 0.5, %v1955_v10 }
  0x2e   : > { %370 = vrot.lane.b32.xlu1 %v1859_v21, %s1797_s13  ;;  %325 = vrot.lane.b32.xlu0 %v1859_v21, %s1798_s14  ;;  %v832_v25 = vmul.f32 %v1890_v23, %v1859_v21  ;;  %v1952_v6 = vfloor.f32 %v132_v0  ;;  %v2009_v0 = vadd.s32 16, %v1905_v38 }
  0x2f   : > { %v833_v26 = vmul.f32 %v1893_v24, %v1863_v22  ;;  %v161_v7 = vmul.f32 5.0, %v1949_v1  ;;  %v1968_v17 = vadd.f32 -2.0, %v1949_v1 }
  0x30   : > { %v834_v27 = vrot.slane %v832_v25, 4  ;;  %v136_v14 = vmul.f32 16.0, %v1952_v6 }
  0x31   : > { %v840_v28 = vrot.slane %v833_v26, 4  ;;  %v1961_v15 = vsub.f32 %v1935_v49, %v161_v7  ;;  %v1989_v39 = vadd.f32 %v1968_v17, %v1957_v13 }
  0x32   : > { %372 = vrot.lane.b32.xlu1 %v1863_v22, %s1797_s13  ;;  %327 = vrot.lane.b32.xlu0 %v1863_v22, %s1798_s14  ;;  %v835_v29 = vadd.f32 %v834_v27, %v832_v25  ;;  %v137_v25 = vmul.f32 16.0, %v1957_v13  ;;  %s2019_s14 = scalar_lea.vmem %s2636_s1, %s1722_s10 }
  0x33   : > { %v841_v30 = vadd.f32 %v840_v28, %v833_v26  ;;  %v1972_v26 = vsub.f32 %v128_v54, %v136_v14  ;;  %v1975_v27 = vadd.f32 -2.0, %v1961_v15  ;;  %v1977_v28 = vadd.f32 %v293_v16, %v292_v8  ;;  %281 = vst [vmem:[%s2019_s14] sm:$0x77] %v1796_v18 }
  0x34   : > { %v836_v33 = vrot.slane %v835_v29, 2  ;;  %v1998_v54 = vsub.f32 %v129_v58, %v137_v25 }
  0x35   : > { %v842_v34 = vrot.slane %v841_v30, 2  ;;  %v2002_v55 = vadd.f32 %v1975_v27, %v1972_v26 }
  0x36   : > { %414 = vrot.lane.b32.xlu1 %v1863_v22, %s1799_s15  ;;  %412 = vrot.lane.b32.xlu0 %v1859_v21, %s1799_s15  ;;  %v837_v36 = vadd.f32 %v836_v33, %v835_v29 }
  0x37   : > { %v843_v37 = vadd.f32 %v842_v34, %v841_v30 }
  0x38   : > { %v838_v40 = vrot.slane %v837_v36, 1 }
  0x39   : > { %v844_v41 = vrot.slane %v843_v37, 1 }
  0x3a   : > { %456 = vrot.lane.b32.xlu1 %v1863_v22, %s1800_s16  ;;  %454 = vrot.lane.b32.xlu0 %v1859_v21, %s1800_s16  ;;  %v839_v42 = vadd.f32 %v838_v40, %v837_v36  ;;  %v1991_v40 = vadd.f32 %v299_v19, %v298_v9 }
  0x3b   : > { %v845_v43 = vadd.f32 %v844_v41, %v843_v37  ;;  %v1985_v37 = vadd.f32 %v1968_v17, %v1952_v6  ;;  %v154_v41 = vmul.f32 0.2, %v150_v20 }
  0x3d   : > { %v848_v45 = vcombine.low %v839_v42, %v845_v43  ;;  %v2006_v63 = vfloor.f32 %v154_v41 }
  0x3e   : > { %498 = vrot.lane.b32.xlu1 %v1863_v22, %s1801_s17  ;;  %496 = vrot.lane.b32.xlu0 %v1859_v21, %s1801_s17 }
  0x3f   : > { %v855_v46 = vrot.slane %v848_v45, %v1910_v44 }
  0x41   : > { %v862_v47 = vrot.slane %v855_v46, %v1910_v44 }
  0x42   : > { %540 = vrot.lane.b32.xlu1 %v1863_v22, %s1802_s18  ;;  %538 = vrot.lane.b32.xlu0 %v1859_v21, %s1802_s18 }
  0x43   : > { %865 = vst.msk [vmem:[#allocation2 + $0x14] ss:$8 sm:$0x3] %vm1916_vm0, %v862_v47 }
  0x46   : > { %582 = vrot.lane.b32.xlu1 %v1863_v22, %s1803_s19  ;;  %580 = vrot.lane.b32.xlu0 %v1859_v21, %s1803_s19 }
  0x4a   : > { %624 = vrot.lane.b32.xlu1 %v1863_v22, %s1804_s20  ;;  %622 = vrot.lane.b32.xlu0 %v1859_v21, %s1804_s20 }
  0x4e   : > { %666 = vrot.lane.b32.xlu1 %v1863_v22, %s1805_s21  ;;  %664 = vrot.lane.b32.xlu0 %v1859_v21, %s1805_s21 }
  0x52   : > { %708 = vrot.lane.b32.xlu1 %v1863_v22, %s1806_s22  ;;  %706 = vrot.lane.b32.xlu0 %v1859_v21, %s1806_s22 }
  0x56   : > { %750 = vrot.lane.b32.xlu1 %v1863_v22, %s1807_s23  ;;  %748 = vrot.lane.b32.xlu0 %v1859_v21, %s1807_s23 }
  0x5a   : > { %792 = vrot.lane.b32.xlu1 %v1863_v22, %s1808_s24  ;;  %790 = vrot.lane.b32.xlu0 %v1859_v21, %s1808_s24 }
  0x5e   : > { %869 = vrot.lane.b32.xlu1 %v1863_v22, %s1809_s25  ;;  %867 = vrot.lane.b32.xlu0 %v1859_v21, %s1809_s25 }
  0x62   : > { %911 = vrot.lane.b32.xlu1 %v1863_v22, %s1810_s26  ;;  %909 = vrot.lane.b32.xlu0 %v1859_v21, %s1810_s26 }
  0x66   : > { %953 = vrot.lane.b32.xlu1 %v1863_v22, %s1811_s27  ;;  %951 = vrot.lane.b32.xlu0 %v1859_v21, %s1811_s27 }
  0x6a   : > { %995 = vrot.lane.b32.xlu1 %v1863_v22, %s1813_s28  ;;  %993 = vrot.lane.b32.xlu0 %v1859_v21, %s1813_s28 }
  0x6e   : > { %1037 = vrot.lane.b32.xlu1 %v1863_v22, %s1814_s29  ;;  %1035 = vrot.lane.b32.xlu0 %v1859_v21, %s1814_s29 }
  0x72   : > { %1079 = vrot.lane.b32.xlu1 %v1863_v22, %s1815_s30  ;;  %1077 = vrot.lane.b32.xlu0 %v1859_v21, %s1815_s30 }
  0x76   : > { %1121 = vrot.lane.b32.xlu1 %v1863_v22, %s1816_s2  ;;  %1119 = vrot.lane.b32.xlu0 %v1859_v21, %s1816_s2 }
  0x7a   : > { %1163 = vrot.lane.b32.xlu1 %v1863_v22, %s1817_s3  ;;  %1161 = vrot.lane.b32.xlu0 %v1859_v21, %s1817_s3 }
  0x7e   : > { %1205 = vrot.lane.b32.xlu1 %v1863_v22, %s1818_s4  ;;  %1203 = vrot.lane.b32.xlu0 %v1859_v21, %s1818_s4 }
  0x82   : > { %1247 = vrot.lane.b32.xlu1 %v1863_v22, %s1819_s5  ;;  %1245 = vrot.lane.b32.xlu0 %v1859_v21, %s1819_s5 }
  0x86   : > { %1289 = vrot.lane.b32.xlu1 %v1863_v22, %s1820_s7  ;;  %1287 = vrot.lane.b32.xlu0 %v1859_v21, %s1820_s7 }
  0x8a   : > { %1331 = vrot.lane.b32.xlu1 %v1863_v22, %s1821_s9  ;;  %1329 = vrot.lane.b32.xlu0 %v1859_v21, %s1821_s9 }
  0xa0   : > { %v371_v11 = vpop.permute.xlu1 %370  ;;  %v326_v12 = vpop.permute.xlu0 %325 }
  0xa4   : > { %v373_v21 = vpop.permute.xlu1 %372  ;;  %v328_v22 = vpop.permute.xlu0 %327 }
  0xa5   : > { %v375_v29 = vsel %vm374_vm1, %v371_v11, %v373_v21  ;;  %v376_v30 = vsel %vm374_vm1, %v373_v21, %v371_v11  ;;  %v330_v31 = vsel %vm329_vm2, %v326_v12, %v328_v22  ;;  %v331_v32 = vsel %vm329_vm2, %v328_v22, %v326_v12 }
  0xa6   : > { %v377_v33 = vmul.f32 %v1890_v23, %v376_v30  ;;  %v378_v34 = vmul.f32 %v1893_v24, %v375_v29  ;;  %v332_v35 = vmul.f32 %v1890_v23, %v331_v32  ;;  %v333_v36 = vmul.f32 %v1893_v24, %v330_v31 }
  0xa7   : > { %vm997_vm1 = vcmp.lt.s32.totalorder %v1939_v51, 113  ;;  %vm1039_vm2 = vcmp.lt.s32.totalorder %v1939_v51, 112 }
  0xa8   : > { %v379_v42 = vrot.slane %v377_v33, 4  ;;  %v385_v43 = vrot.slane %v378_v34, 4  ;;  %v334_v45 = vrot.slane %v332_v35, 4  ;;  %v340_v46 = vrot.slane %v333_v36, 4  ;;  %v415_v47 = vpop.permute.xlu1 %414  ;;  %v413_v50 = vpop.permute.xlu0 %412 }
  0xa9   : > { %v417_v52 = vsel %vm416_vm3, %v413_v50, %v415_v47  ;;  %v418_v53 = vsel %vm416_vm3, %v415_v47, %v413_v50  ;;  %vm1081_vm3 = vcmp.lt.s32.totalorder %v1939_v51, 111 }
  0xaa   : > { %v380_v56 = vadd.f32 %v379_v42, %v377_v33  ;;  %v386_v57 = vadd.f32 %v385_v43, %v378_v34  ;;  %v335_v59 = vadd.f32 %v334_v45, %v332_v35  ;;  %v341_v60 = vadd.f32 %v340_v46, %v333_v36 }
  0xab   : > { %v419_v61 = vmul.f32 %v1890_v23, %v418_v53  ;;  %v420_v62 = vmul.f32 %v1893_v24, %v417_v52 }
  0xac   : > { %v381_v58 = vrot.slane %v380_v56, 2  ;;  %v387_v2 = vrot.slane %v386_v57, 2  ;;  %v336_v3 = vrot.slane %v335_v59, 2  ;;  %v342_v4 = vrot.slane %v341_v60, 2  ;;  %v457_v5 = vpop.permute.xlu1 %456  ;;  %v455_v7 = vpop.permute.xlu0 %454 }
  0xad   : > { %v421_v8 = vrot.slane %v419_v61, 4  ;;  %v427_v9 = vrot.slane %v420_v62, 4  ;;  %v459_v11 = vsel %vm458_vm4, %v455_v7, %v457_v5  ;;  %v460_v12 = vsel %vm458_vm4, %v457_v5, %v455_v7 }
  0xae   : > { %v382_v14 = vadd.f32 %v381_v58, %v380_v56  ;;  %v388_v16 = vadd.f32 %v387_v2, %v386_v57  ;;  %v337_v19 = vadd.f32 %v336_v3, %v335_v59  ;;  %v343_v20 = vadd.f32 %v342_v4, %v341_v60 }
  0xaf   : > { %v422_v21 = vadd.f32 %v421_v8, %v419_v61  ;;  %v428_v22 = vadd.f32 %v427_v9, %v420_v62  ;;  %v461_v25 = vmul.f32 %v1890_v23, %v460_v12  ;;  %v462_v29 = vmul.f32 %v1893_v24, %v459_v11 }
  0xb0   : > { %v383_v30 = vrot.slane %v382_v14, 1  ;;  %v389_v31 = vrot.slane %v388_v16, 1  ;;  %v338_v32 = vrot.slane %v337_v19, 1  ;;  %v344_v33 = vrot.slane %v343_v20, 1  ;;  %v499_v34 = vpop.permute.xlu1 %498  ;;  %v497_v35 = vpop.permute.xlu0 %496 }
  0xb1   : > { %v423_v36 = vrot.slane %v422_v21, 2  ;;  %v429_v41 = vrot.slane %v428_v22, 2  ;;  %v463_v42 = vrot.slane %v461_v25, 4  ;;  %v469_v43 = vrot.slane %v462_v29, 4 }
  0xb2   : > { %v384_v45 = vadd.f32 %v383_v30, %v382_v14  ;;  %v390_v46 = vadd.f32 %v389_v31, %v388_v16  ;;  %v339_v47 = vadd.f32 %v338_v32, %v337_v19  ;;  %v345_v50 = vadd.f32 %v344_v33, %v343_v20 }
  0xb3   : > { %v424_v52 = vadd.f32 %v423_v36, %v422_v21  ;;  %v430_v53 = vadd.f32 %v429_v41, %v428_v22  ;;  %v464_v56 = vadd.f32 %v463_v42, %v461_v25  ;;  %v470_v57 = vadd.f32 %v469_v43, %v462_v29 }
  0xb4   : > { %v393_v59 = vcombine.low %v384_v45, %v390_v46  ;;  %v348_v60 = vcombine.low %v339_v47, %v345_v50  ;;  %v501_v61 = vsel %vm500_vm5, %v497_v35, %v499_v34  ;;  %v502_v62 = vsel %vm500_vm5, %v499_v34, %v497_v35  ;;  %v541_v58 = vpop.permute.xlu1 %540  ;;  %v539_v2 = vpop.permute.xlu0 %538 }
  0xb5   : > { %v425_v3 = vrot.slane %v424_v52, 1  ;;  %v431_v4 = vrot.slane %v430_v53, 1  ;;  %v465_v5 = vrot.slane %v464_v56, 2  ;;  %v471_v7 = vrot.slane %v470_v57, 2 }
  0xb6   : > { %v400_v8 = vrot.slane %v393_v59, %v1910_v44  ;;  %v355_v9 = vrot.slane %v348_v60, %v1910_v44  ;;  %v503_v11 = vmul.f32 %v1890_v23, %v502_v62  ;;  %v504_v12 = vmul.f32 %v1893_v24, %v501_v61 }
  0xb7   : > { %v426_v14 = vadd.f32 %v425_v3, %v424_v52  ;;  %v432_v16 = vadd.f32 %v431_v4, %v430_v53  ;;  %v466_v19 = vadd.f32 %v465_v5, %v464_v56  ;;  %v472_v20 = vadd.f32 %v471_v7, %v470_v57 }
  0xb8   : > { %v407_v21 = vrot.slane %v400_v8, %v1910_v44  ;;  %v362_v22 = vrot.slane %v355_v9, %v1910_v44  ;;  %v505_v25 = vrot.slane %v503_v11, 4  ;;  %v511_v29 = vrot.slane %v504_v12, 4  ;;  %v583_v30 = vpop.permute.xlu1 %582  ;;  %v581_v31 = vpop.permute.xlu0 %580 }
  0xb9   : > { %v435_v32 = vcombine.low %v426_v14, %v432_v16  ;;  %v467_v33 = vrot.slane %v466_v19, 1  ;;  %v473_v34 = vrot.slane %v472_v20, 1  ;;  %v543_v35 = vsel %vm542_vm6, %v539_v2, %v541_v58 }
  0xba   : > { %410 = vst.msk [vmem:[#allocation2 + $0x1] ss:$8 sm:$0x3] %vm1916_vm0, %v407_v21  ;;  %368 = vst.msk [vmem:[#allocation2] ss:$8 sm:$0x3] %vm1916_vm0, %v362_v22  ;;  %v506_v36 = vadd.f32 %v505_v25, %v503_v11  ;;  %v512_v41 = vadd.f32 %v511_v29, %v504_v12  ;;  %v544_v42 = vsel %vm542_vm6, %v541_v58, %v539_v2 }
  0xbb   : > { %v546_v43 = vmul.f32 %v1893_v24, %v543_v35  ;;  %v442_v45 = vrot.slane %v435_v32, %v1910_v44  ;;  %v468_v46 = vadd.f32 %v467_v33, %v466_v19  ;;  %v474_v47 = vadd.f32 %v473_v34, %v472_v20 }
  0xbc   : > { %v545_v50 = vmul.f32 %v1890_v23, %v544_v42  ;;  %v507_v52 = vrot.slane %v506_v36, 2  ;;  %v513_v53 = vrot.slane %v512_v41, 2  ;;  %v585_v57 = vsel %vm584_vm7, %v581_v31, %v583_v30  ;;  %v625_v59 = vpop.permute.xlu1 %624  ;;  %v623_v60 = vpop.permute.xlu0 %622 }
  0xbd   : > { %v553_v56 = vrot.slane %v546_v43, 4  ;;  %v449_v61 = vrot.slane %v442_v45, %v1910_v44  ;;  %v477_v62 = vcombine.low %v468_v46, %v474_v47  ;;  %v586_v2 = vsel %vm584_vm7, %v583_v30, %v581_v31 }
  0xbe   : > { %v547_v58 = vrot.slane %v545_v50, 4  ;;  %v508_v3 = vadd.f32 %v507_v52, %v506_v36  ;;  %v514_v4 = vadd.f32 %v513_v53, %v512_v41  ;;  %v587_v7 = vmul.f32 %v1890_v23, %v586_v2 }
  0xbf   : > { %v554_v5 = vadd.f32 %v553_v56, %v546_v43  ;;  %452 = vst.msk [vmem:[#allocation2 + $0x2] ss:$8 sm:$0x3] %vm1916_vm0, %v449_v61  ;;  %v484_v8 = vrot.slane %v477_v62, %v1910_v44  ;;  %v588_v11 = vmul.f32 %v1893_v24, %v585_v57  ;;  %v627_v12 = vsel %vm626_vm8, %v623_v60, %v625_v59 }
  0xc0   : > { %v548_v9 = vadd.f32 %v547_v58, %v545_v50  ;;  %v509_v14 = vrot.slane %v508_v3, 1  ;;  %v515_v16 = vrot.slane %v514_v4, 1  ;;  %v589_v20 = vrot.slane %v587_v7, 4  ;;  %v667_v21 = vpop.permute.xlu1 %666  ;;  %v665_v22 = vpop.permute.xlu0 %664 }
  0xc1   : > { %v555_v19 = vrot.slane %v554_v5, 2  ;;  %v491_v25 = vrot.slane %v484_v8, %v1910_v44  ;;  %v595_v30 = vrot.slane %v588_v11, 4  ;;  %v628_v31 = vsel %vm626_vm8, %v625_v59, %v623_v60 }
  0xc2   : > { %v549_v29 = vrot.slane %v548_v9, 2  ;;  %v510_v32 = vadd.f32 %v509_v14, %v508_v3  ;;  %v516_v33 = vadd.f32 %v515_v16, %v514_v4  ;;  %v590_v35 = vadd.f32 %v589_v20, %v587_v7 }
  0xc3   : > { %v556_v34 = vadd.f32 %v555_v19, %v554_v5  ;;  %494 = vst.msk [vmem:[#allocation2 + $0x3] ss:$8 sm:$0x3] %vm1916_vm0, %v491_v25  ;;  %v596_v41 = vadd.f32 %v595_v30, %v588_v11  ;;  %v629_v42 = vmul.f32 %v1890_v23, %v628_v31  ;;  %v630_v43 = vmul.f32 %v1893_v24, %v627_v12 }
  0xc4   : > { %v550_v36 = vadd.f32 %v549_v29, %v548_v9  ;;  %v519_v45 = vcombine.low %v510_v32, %v516_v33  ;;  %v591_v47 = vrot.slane %v590_v35, 2  ;;  %v669_v50 = vsel %vm668_vm9, %v665_v22, %v667_v21  ;;  %v709_v52 = vpop.permute.xlu1 %708  ;;  %v707_v53 = vpop.permute.xlu0 %706 }
  0xc5   : > { %v557_v46 = vrot.slane %v556_v34, 1  ;;  %v597_v57 = vrot.slane %v596_v41, 2  ;;  %v631_v59 = vrot.slane %v629_v42, 4  ;;  %v637_v60 = vrot.slane %v630_v43, 4 }
  0xc6   : > { %v551_v56 = vrot.slane %v550_v36, 1  ;;  %v526_v61 = vrot.slane %v519_v45, %v1910_v44  ;;  %v592_v58 = vadd.f32 %v591_v47, %v590_v35  ;;  %v670_v2 = vsel %vm668_vm9, %v667_v21, %v665_v22 }
  0xc7   : > { %v558_v62 = vadd.f32 %v557_v46, %v556_v34  ;;  %v598_v4 = vadd.f32 %v597_v57, %v596_v41  ;;  %v632_v5 = vadd.f32 %v631_v59, %v629_v42  ;;  %v638_v7 = vadd.f32 %v637_v60, %v630_v43 }
  0xc8   : > { %v552_v3 = vadd.f32 %v551_v56, %v550_v36  ;;  %v533_v8 = vrot.slane %v526_v61, %v1910_v44  ;;  %v593_v9 = vrot.slane %v592_v58, 1  ;;  %v671_v11 = vmul.f32 %v1890_v23, %v670_v2  ;;  %v751_v14 = vpop.permute.xlu1 %750  ;;  %v749_v16 = vpop.permute.xlu0 %748 }
  0xc9   : > { %v672_v12 = vmul.f32 %v1893_v24, %v669_v50  ;;  %v599_v20 = vrot.slane %v598_v4, 1  ;;  %v633_v25 = vrot.slane %v632_v5, 2  ;;  %v639_v29 = vrot.slane %v638_v7, 2 }
  0xca   : > { %v561_v19 = vcombine.low %v552_v3, %v558_v62  ;;  %536 = vst.msk [vmem:[#allocation2 + $0x4] ss:$8 sm:$0x3] %vm1916_vm0, %v533_v8  ;;  %v594_v21 = vadd.f32 %v593_v9, %v592_v58  ;;  %v673_v22 = vrot.slane %v671_v11, 4  ;;  %v711_v31 = vsel %vm710_vm10, %v707_v53, %v709_v52 }
  0xcb   : > { %v679_v30 = vrot.slane %v672_v12, 4  ;;  %v600_v33 = vadd.f32 %v599_v20, %v598_v4  ;;  %v634_v34 = vadd.f32 %v633_v25, %v632_v5  ;;  %v640_v35 = vadd.f32 %v639_v29, %v638_v7 }
  0xcc   : > { %v568_v32 = vrot.slane %v561_v19, %v1910_v44  ;;  %v674_v36 = vadd.f32 %v673_v22, %v671_v11  ;;  %v712_v42 = vsel %vm710_vm10, %v709_v52, %v707_v53  ;;  %v714_v43 = vmul.f32 %v1893_v24, %v711_v31  ;;  %v793_v45 = vpop.permute.xlu1 %792  ;;  %v791_v46 = vpop.permute.xlu0 %790 }
  0xcd   : > { %v680_v41 = vadd.f32 %v679_v30, %v672_v12  ;;  %v603_v50 = vcombine.low %v594_v21, %v600_v33  ;;  %v635_v56 = vrot.slane %v634_v34, 1  ;;  %v641_v57 = vrot.slane %v640_v35, 1 }
  0xce   : > { %v575_v47 = vrot.slane %v568_v32, %v1910_v44  ;;  %v675_v59 = vrot.slane %v674_v36, 2  ;;  %v713_v61 = vmul.f32 %v1890_v23, %v712_v42  ;;  %v721_v62 = vrot.slane %v714_v43, 4 }
  0xcf   : > { %v681_v60 = vrot.slane %v680_v41, 2  ;;  %v610_v52 = vrot.slane %v603_v50, %v1910_v44  ;;  %v636_v53 = vadd.f32 %v635_v56, %v634_v34  ;;  %v642_v58 = vadd.f32 %v641_v57, %v640_v35 }
  0xd0   : > { %578 = vst.msk [vmem:[#allocation2 + $0x5] ss:$8 sm:$0x3] %vm1916_vm0, %v575_v47  ;;  %v753_v2 = vsel %vm752_vm11, %v749_v16, %v751_v14  ;;  %v676_v3 = vadd.f32 %v675_v59, %v674_v36  ;;  %v715_v5 = vrot.slane %v713_v61, 4  ;;  %v722_v7 = vadd.f32 %v721_v62, %v714_v43  ;;  %v870_v8 = vpop.permute.xlu1 %869  ;;  %v868_v9 = vpop.permute.xlu0 %867 }
  0xd1   : > { %v682_v4 = vadd.f32 %v681_v60, %v680_v41  ;;  %v617_v11 = vrot.slane %v610_v52, %v1910_v44  ;;  %v645_v12 = vcombine.low %v636_v53, %v642_v58  ;;  %v754_v19 = vsel %vm752_vm11, %v751_v14, %v749_v16 }
  0xd2   : > { %v756_v20 = vmul.f32 %v1893_v24, %v753_v2  ;;  %v677_v25 = vrot.slane %v676_v3, 1  ;;  %v716_v21 = vadd.f32 %v715_v5, %v713_v61  ;;  %v723_v22 = vrot.slane %v722_v7, 2 }
  0xd3   : > { %v683_v29 = vrot.slane %v682_v4, 1  ;;  %620 = vst.msk [vmem:[#allocation2 + $0x6] ss:$8 sm:$0x3] %vm1916_vm0, %v617_v11  ;;  %v652_v30 = vrot.slane %v645_v12, %v1910_v44  ;;  %v755_v31 = vmul.f32 %v1890_v23, %v754_v19  ;;  %v795_v33 = vsel %vm794_vm12, %v791_v46, %v793_v45 }
  0xd4   : > { %v763_v32 = vrot.slane %v756_v20, 4  ;;  %v678_v34 = vadd.f32 %v677_v25, %v676_v3  ;;  %v717_v14 = vrot.slane %v716_v21, 2  ;;  %v724_v16 = vadd.f32 %v723_v22, %v722_v7  ;;  %v912_v36 = vpop.permute.xlu1 %911  ;;  %v910_v41 = vpop.permute.xlu0 %909 }
  0xd5   : > { %v684_v35 = vadd.f32 %v683_v29, %v682_v4  ;;  %v659_v42 = vrot.slane %v652_v30, %v1910_v44  ;;  %v757_v43 = vrot.slane %v755_v31, 4  ;;  %v796_v50 = vsel %vm794_vm12, %v793_v45, %v791_v46 }
  0xd6   : > { %v764_v47 = vadd.f32 %v763_v32, %v756_v20  ;;  %v718_v57 = vadd.f32 %v717_v14, %v716_v21  ;;  %v725_v59 = vrot.slane %v724_v16, 1  ;;  %v797_v60 = vmul.f32 %v1890_v23, %v796_v50 }
  0xd7   : > { %v687_v56 = vcombine.low %v678_v34, %v684_v35  ;;  %662 = vst.msk [vmem:[#allocation2 + $0x7] ss:$8 sm:$0x3] %vm1916_vm0, %v659_v42  ;;  %v758_v61 = vadd.f32 %v757_v43, %v755_v31  ;;  %v798_v52 = vmul.f32 %v1893_v24, %v795_v33  ;;  %v872_v53 = vsel %vm871_vm13, %v868_v9, %v870_v8 }
  0xd8   : > { %v765_v62 = vrot.slane %v764_v47, 2  ;;  %v719_v2 = vrot.slane %v718_v57, 1  ;;  %v726_v3 = vadd.f32 %v725_v59, %v724_v16  ;;  %v799_v45 = vrot.slane %v797_v60, 4  ;;  %v954_v46 = vpop.permute.xlu1 %953  ;;  %v952_v4 = vpop.permute.xlu0 %951 }
  0xd9   : > { %v694_v58 = vrot.slane %v687_v56, %v1910_v44  ;;  %v759_v5 = vrot.slane %v758_v61, 2  ;;  %v805_v11 = vrot.slane %v798_v52, 4  ;;  %v873_v12 = vsel %vm871_vm13, %v870_v8, %v868_v9 }
  0xda   : > { %v766_v7 = vadd.f32 %v765_v62, %v764_v47  ;;  %v720_v20 = vadd.f32 %v719_v2, %v718_v57  ;;  %v800_v25 = vadd.f32 %v799_v45, %v797_v60  ;;  %v874_v29 = vmul.f32 %v1890_v23, %v872_v53 }
  0xdb   : > { %v701_v19 = vrot.slane %v694_v58, %v1910_v44  ;;  %v760_v21 = vadd.f32 %v759_v5, %v758_v61  ;;  %v806_v30 = vadd.f32 %v805_v11, %v798_v52  ;;  %v875_v31 = vmul.f32 %v1893_v24, %v873_v12 }
  0xdc   : > { %v767_v22 = vrot.slane %v766_v7, 1  ;;  %v729_v32 = vcombine.low %v720_v20, %v726_v3  ;;  %v801_v33 = vrot.slane %v800_v25, 2  ;;  %v876_v34 = vrot.slane %v874_v29, 4  ;;  %v996_v35 = vpop.permute.xlu1 %995  ;;  %v994_v14 = vpop.permute.xlu0 %993 }
  0xdd   : > { %704 = vst.msk [vmem:[#allocation2 + $0x10] ss:$8 sm:$0x3] %vm1916_vm0, %v701_v19  ;;  %v2126_v8 = vcvt.s32.f32 %v2009_v0  ;;  %v761_v9 = vrot.slane %v760_v21, 1  ;;  %v807_v42 = vrot.slane %v806_v30, 2  ;;  %v882_v43 = vrot.slane %v875_v31, 4 }
  0xde   : > { %v768_v16 = vadd.f32 %v767_v22, %v766_v7  ;;  %v736_v47 = vrot.slane %v729_v32, %v1910_v44  ;;  %v802_v50 = vadd.f32 %v801_v33, %v800_v25  ;;  %v877_v56 = vadd.f32 %v876_v34, %v874_v29 }
  0xdf   : > { %v762_v57 = vadd.f32 %v761_v9, %v760_v21  ;;  %v808_v59 = vadd.f32 %v807_v42, %v806_v30  ;;  %v914_v60 = vsel %vm913_vm14, %v910_v41, %v912_v36  ;;  %v915_v61 = vsel %vm913_vm14, %v912_v36, %v910_v41 }
  0xe0   : > { %v743_v0 = vrot.slane %v736_v47, %v1910_v44  ;;  %v803_v62 = vrot.slane %v802_v50, 1  ;;  %v878_v52 = vrot.slane %v877_v56, 2  ;;  %v883_v53 = vadd.f32 %v882_v43, %v875_v31  ;;  %v1038_v11 = vpop.permute.xlu1 %1037  ;;  %v1036_v12 = vpop.permute.xlu0 %1035 }
  0xe1   : > { %v771_v58 = vcombine.low %v762_v57, %v768_v16  ;;  %v809_v2 = vrot.slane %v808_v59, 1  ;;  %v2137_v3 = vmul.f32 5.0, %v2006_v63  ;;  %v2140_v45 = vadd.f32 0.5, %v2126_v8 }
  0xe2   : > { %746 = vst.msk [vmem:[#allocation2 + $0x11] ss:$8 sm:$0x3] %vm1916_vm0, %v743_v0  ;;  %v804_v5 = vadd.f32 %v803_v62, %v802_v50  ;;  %v879_v36 = vadd.f32 %v878_v52, %v877_v56  ;;  %v884_v41 = vrot.slane %v883_v53, 2  ;;  %v916_v7 = vmul.f32 %v1890_v23, %v914_v60 }
  0xe3   : > { %v778_v19 = vrot.slane %v771_v58, %v1910_v44  ;;  %v810_v20 = vadd.f32 %v809_v2, %v808_v59  ;;  %v917_v25 = vmul.f32 %v1893_v24, %v915_v61  ;;  %v956_v29 = vsel %vm955_vm15, %v952_v4, %v954_v46 }
  0xe4   : > { %v880_v21 = vrot.slane %v879_v36, 1  ;;  %v885_v22 = vadd.f32 %v884_v41, %v883_v53  ;;  %v918_v30 = vrot.slane %v916_v7, 4  ;;  %v957_v31 = vsel %vm955_vm15, %v954_v46, %v952_v4  ;;  %v1080_v0 = vpop.permute.xlu1 %1079  ;;  %v1078_v62 = vpop.permute.xlu0 %1077 }
  0xe5   : > { %v785_v32 = vrot.slane %v778_v19, %v1910_v44  ;;  %v813_v33 = vcombine.low %v804_v5, %v810_v20  ;;  %v924_v34 = vrot.slane %v917_v25, 4  ;;  %v958_v9 = vmul.f32 %v1890_v23, %v956_v29 }
  0xe6   : > { %v881_v16 = vadd.f32 %v880_v21, %v879_v36  ;;  %v886_v42 = vrot.slane %v885_v22, 1  ;;  %v919_v43 = vadd.f32 %v918_v30, %v916_v7  ;;  %v959_v47 = vmul.f32 %v1893_v24, %v957_v31 }
  0xe7   : > { %788 = vst.msk [vmem:[#allocation2 + $0x12] ss:$8 sm:$0x3] %vm1916_vm0, %v785_v32  ;;  %v820_v50 = vrot.slane %v813_v33, %v1910_v44  ;;  %v925_v56 = vadd.f32 %v924_v34, %v917_v25  ;;  %v960_v46 = vrot.slane %v958_v9, 4  ;;  %v998_v4 = vsel %vm997_vm1, %v994_v14, %v996_v35 }
  0xe8   : > { %v887_v57 = vadd.f32 %v886_v42, %v885_v22  ;;  %v920_v59 = vrot.slane %v919_v43, 2  ;;  %v966_v60 = vrot.slane %v959_v47, 4  ;;  %v999_v61 = vsel %vm997_vm1, %v996_v35, %v994_v14 }
  0xe9   : > { %v827_v52 = vrot.slane %v820_v50, %v1910_v44  ;;  %v926_v53 = vrot.slane %v925_v56, 2  ;;  %v961_v58 = vadd.f32 %v960_v46, %v958_v9  ;;  %v1000_v2 = vmul.f32 %v1890_v23, %v998_v4 }
  0xea   : > { %v890_v5 = vcombine.low %v881_v16, %v887_v57  ;;  %v921_v36 = vadd.f32 %v920_v59, %v919_v43  ;;  %v967_v41 = vadd.f32 %v966_v60, %v959_v47  ;;  %v1001_v7 = vmul.f32 %v1893_v24, %v999_v61  ;;  %v1122_v43 = vpop.permute.xlu1 %1121  ;;  %v1120_v47 = vpop.permute.xlu0 %1119 }
  0xeb   : > { %830 = vst.msk [vmem:[#allocation2 + $0x13] ss:$8 sm:$0x3] %vm1916_vm0, %v827_v52  ;;  %v927_v19 = vadd.f32 %v926_v53, %v925_v56  ;;  %v962_v20 = vrot.slane %v961_v58, 2  ;;  %v1002_v25 = vrot.slane %v1000_v2, 4  ;;  %v1040_v35 = vsel %vm1039_vm2, %v1036_v12, %v1038_v11 }
  0xec   : > { %v897_v14 = vrot.slane %v890_v5, %v1910_v44  ;;  %v922_v29 = vrot.slane %v921_v36, 1  ;;  %v968_v21 = vrot.slane %v967_v41, 2  ;;  %v1008_v22 = vrot.slane %v1001_v7, 4 }
  0xed   : > { %vm1123_vm4 = vcmp.lt.s32.totalorder %v1939_v51, 110  ;;  %v928_v30 = vrot.slane %v927_v19, 1  ;;  %v963_v31 = vadd.f32 %v962_v20, %v961_v58  ;;  %v1003_v32 = vadd.f32 %v1002_v25, %v1000_v2 }
  0xee   : > { %v1041_v33 = vsel %vm1039_vm2, %v1038_v11, %v1036_v12  ;;  %v904_v34 = vrot.slane %v897_v14, %v1910_v44  ;;  %v923_v9 = vadd.f32 %v922_v29, %v921_v36  ;;  %v969_v16 = vadd.f32 %v968_v21, %v967_v41  ;;  %v1164_v21 = vpop.permute.xlu1 %1163 }
  0xef   : > { %v1009_v42 = vadd.f32 %v1008_v22, %v1001_v7  ;;  %v929_v50 = vadd.f32 %v928_v30, %v927_v19  ;;  %v964_v56 = vrot.slane %v963_v31, 1  ;;  %v1004_v46 = vrot.slane %v1003_v32, 2  ;;  %v1162_v22 = vpop.permute.xlu0 %1161 }
  0xf0   : > { %v1042_v4 = vmul.f32 %v1890_v23, %v1040_v35  ;;  %vm1165_vm5 = vcmp.lt.s32.totalorder %v1939_v51, 98  ;;  %907 = vst.msk [vmem:[#allocation2 + $0x15] ss:$8 sm:$0x3] %vm1916_vm0, %v904_v34  ;;  %v970_v57 = vrot.slane %v969_v16, 1  ;;  %v1043_v11 = vmul.f32 %v1893_v24, %v1041_v33 }
  0xf1   : > { %v1010_v59 = vrot.slane %v1009_v42, 2  ;;  %v1082_v12 = vsel %vm1081_vm3, %v1078_v62, %v1080_v0  ;;  %v932_v60 = vcombine.low %v923_v9, %v929_v50  ;;  %v965_v61 = vadd.f32 %v964_v56, %v963_v31 }
  0xf2   : > { %v1005_v52 = vadd.f32 %v1004_v46, %v1003_v32  ;;  %v1044_v53 = vrot.slane %v1042_v4, 4  ;;  %v971_v58 = vadd.f32 %v970_v57, %v969_v16  ;;  %v1050_v5 = vrot.slane %v1043_v11, 4 }
  0xf3   : > { %v1011_v2 = vadd.f32 %v1010_v59, %v1009_v42  ;;  %v1083_v36 = vsel %vm1081_vm3, %v1080_v0, %v1078_v62  ;;  %v939_v41 = vrot.slane %v932_v60, %v1910_v44  ;;  %v1084_v20 = vmul.f32 %v1890_v23, %v1082_v12 }
  0xf4   : > { %v1006_v7 = vrot.slane %v1005_v52, 1  ;;  %v1045_v19 = vadd.f32 %v1044_v53, %v1042_v4  ;;  %vm1207_vm6 = vcmp.lt.s32.totalorder %v1939_v51, 97  ;;  %v974_v25 = vcombine.low %v965_v61, %v971_v58 }
  0xf5   : > { %v1012_v35 = vrot.slane %v1011_v2, 1  ;;  %v1051_v14 = vadd.f32 %v1050_v5, %v1043_v11  ;;  %v1085_v29 = vmul.f32 %v1893_v24, %v1083_v36  ;;  %v946_v30 = vrot.slane %v939_v41, %v1910_v44 }
  0xf6   : > { %v1007_v31 = vadd.f32 %v1006_v7, %v1005_v52  ;;  %v1046_v32 = vrot.slane %v1045_v19, 2  ;;  %v1086_v0 = vrot.slane %v1084_v20, 4  ;;  %v981_v62 = vrot.slane %v974_v25, %v1910_v44 }
  0xf7   : > { %v1013_v33 = vadd.f32 %v1012_v35, %v1011_v2  ;;  %v1052_v34 = vrot.slane %v1051_v14, 2  ;;  %v1092_v9 = vrot.slane %v1085_v29, 4  ;;  %949 = vst.msk [vmem:[#allocation2 + $0x16] ss:$8 sm:$0x3] %vm1916_vm0, %v946_v30  ;;  %v1124_v50 = vsel %vm1123_vm4, %v1120_v47, %v1122_v43  ;;  %v1204_v2 = vpop.permute.xlu0 %1203 }
  0xf8   : > { %v1047_v16 = vadd.f32 %v1046_v32, %v1045_v19  ;;  %v1087_v42 = vadd.f32 %v1086_v0, %v1084_v20  ;;  %v1125_v56 = vsel %vm1123_vm4, %v1122_v43, %v1120_v47  ;;  %v988_v46 = vrot.slane %v981_v62, %v1910_v44  ;;  %v1206_v47 = vpop.permute.xlu1 %1205  ;;  %v2214_v0 = vld [vmem:[%s1847_s12 + $0x18] sm:$0xff] }
  0xf9   : > { %v1016_v4 = vcombine.low %v1007_v31, %v1013_v33  ;;  %v1053_v57 = vadd.f32 %v1052_v34, %v1051_v14  ;;  %v1093_v59 = vadd.f32 %v1092_v9, %v1085_v29  ;;  %v1126_v60 = vmul.f32 %v1890_v23, %v1124_v50  ;;  %v2208_v29 = vld [vmem:[%s1847_s12 + $0x10] sm:$0xff] }
  0xfa   : > { %v1048_v11 = vrot.slane %v1047_v16, 1  ;;  %v1088_v12 = vrot.slane %v1087_v42, 2  ;;  %v1127_v61 = vmul.f32 %v1893_v24, %v1125_v56  ;;  %991 = vst.msk [vmem:[#allocation2 + $0x17] ss:$8 sm:$0x3] %vm1916_vm0, %v988_v46  ;;  %v1166_v43 = vsel %vm1165_vm5, %v1162_v22, %v1164_v21 }
  0xfb   : > { %v1023_v52 = vrot.slane %v1016_v4, %v1910_v44  ;;  %v1054_v53 = vrot.slane %v1053_v57, 1  ;;  %v1094_v58 = vrot.slane %v1093_v59, 2  ;;  %v1128_v41 = vrot.slane %v1126_v60, 4  ;;  %v1246_v46 = vpop.permute.xlu0 %1245 }
  0xfc   : > { %v1049_v5 = vadd.f32 %v1048_v11, %v1047_v16  ;;  %v1089_v36 = vadd.f32 %v1088_v12, %v1087_v42  ;;  %v1134_v23 = vrot.slane %v1127_v61, 4  ;;  %vm1249_vm7 = vcmp.lt.s32.totalorder %v1939_v51, 96  ;;  %v1248_v56 = vpop.permute.xlu1 %1247 }
  0xfd   : > { %v1030_v24 = vrot.slane %v1023_v52, %v1910_v44  ;;  %v1055_v7 = vadd.f32 %v1054_v53, %v1053_v57  ;;  %v1095_v19 = vadd.f32 %v1094_v58, %v1093_v59  ;;  %v1167_v20 = vsel %vm1165_vm5, %v1164_v21, %v1162_v22 }
  0xfe   : > { %v1090_v25 = vrot.slane %v1089_v36, 1  ;;  %v1129_v35 = vadd.f32 %v1128_v41, %v1126_v60  ;;  %v1135_v14 = vadd.f32 %v1134_v23, %v1127_v61  ;;  %v1168_v30 = vmul.f32 %v2208_v29, %v1166_v43 }
  0xff   : > { %1033 = vst.msk [vmem:[#allocation2 + $0x20] ss:$8 sm:$0x3] %vm1916_vm0, %v1030_v24  ;;  %v1058_v31 = vcombine.low %v1049_v5, %v1055_v7  ;;  %v1096_v32 = vrot.slane %v1095_v19, 1  ;;  %v1169_v62 = vmul.f32 %v2214_v0, %v1167_v20  ;;  %v1208_v33 = vsel %vm1207_vm6, %v1204_v2, %v1206_v47 }
 0x100   : > { %v1091_v21 = vadd.f32 %v1090_v25, %v1089_v36  ;;  %v1130_v22 = vrot.slane %v1129_v35, 2  ;;  %v1136_v34 = vrot.slane %v1135_v14, 2  ;;  %v1170_v9 = vrot.slane %v1168_v30, 4 }
 0x101   : > { %v1065_v16 = vrot.slane %v1058_v31, %v1910_v44  ;;  %v1097_v42 = vadd.f32 %v1096_v32, %v1095_v19  ;;  %v1176_v50 = vrot.slane %v1169_v62, 4  ;;  %v144_v4 = vadd.s32 24, %v1905_v38  ;;  %v1288_v31 = vpop.permute.xlu0 %1287 }
 0x102   : > { %v1131_v57 = vadd.f32 %v1130_v22, %v1129_v35  ;;  %v1137_v59 = vadd.f32 %v1136_v34, %v1135_v14  ;;  %v1171_v11 = vadd.f32 %v1170_v9, %v1168_v30  ;;  %v1209_v12 = vsel %vm1207_vm6, %v1206_v47, %v1204_v2  ;;  %v1290_v30 = vpop.permute.xlu1 %1289 }
 0x103   : > { %v1072_v60 = vrot.slane %v1065_v16, %v1910_v44  ;;  %v1100_v61 = vcombine.low %v1091_v21, %v1097_v42  ;;  %v1210_v52 = vmul.f32 %v2208_v29, %v1208_v33  ;;  %vm1291_vm8 = vcmp.lt.s32.totalorder %v1939_v51, 95 }
 0x104   : > { %v1132_v53 = vrot.slane %v1131_v57, 1  ;;  %v1138_v58 = vrot.slane %v1137_v59, 1  ;;  %v1172_v43 = vrot.slane %v1171_v11, 2  ;;  %v1177_v5 = vadd.f32 %v1176_v50, %v1169_v62 }
 0x105   : > { %1075 = vst.msk [vmem:[#allocation2 + $0x21] ss:$8 sm:$0x3] %vm1916_vm0, %v1072_v60  ;;  %v1107_v36 = vrot.slane %v1100_v61, %v1910_v44  ;;  %v1211_v41 = vmul.f32 %v2214_v0, %v1209_v12  ;;  %v155_v47 = vmul.f32 0.2, %v2140_v45  ;;  %v2231_v2 = vcvt.s32.f32 %v144_v4 }
 0x106   : > { %v1133_v23 = vadd.f32 %v1132_v53, %v1131_v57  ;;  %v1139_v24 = vadd.f32 %v1138_v58, %v1137_v59  ;;  %v1173_v7 = vadd.f32 %v1172_v43, %v1171_v11  ;;  %v1178_v19 = vrot.slane %v1177_v5, 2 }
 0x107   : > { %v1114_v20 = vrot.slane %v1107_v36, %v1910_v44  ;;  %v1212_v25 = vrot.slane %v1210_v52, 4  ;;  %v1218_v35 = vrot.slane %v1211_v41, 4  ;;  %v1250_v14 = vsel %vm1249_vm7, %v1246_v46, %v1248_v56 }
 0x108   : > { %v1142_v32 = vcombine.low %v1133_v23, %v1139_v24  ;;  %v1174_v62 = vrot.slane %v1173_v7, 1  ;;  %v1179_v33 = vadd.f32 %v1178_v19, %v1177_v5  ;;  %v1251_v45 = vsel %vm1249_vm7, %v1248_v56, %v1246_v46 }
 0x109   : > { %1117 = vst.msk [vmem:[#allocation2 + $0x22] ss:$8 sm:$0x3] %vm1916_vm0, %v1114_v20  ;;  %v1213_v21 = vadd.f32 %v1212_v25, %v1210_v52  ;;  %v1219_v22 = vadd.f32 %v1218_v35, %v1211_v41  ;;  %v1252_v34 = vmul.f32 %v2208_v29, %v1250_v14  ;;  %v1253_v9 = vmul.f32 %v2214_v0, %v1251_v45 }
 0x10a   : > { %v1149_v16 = vrot.slane %v1142_v32, %v1910_v44  ;;  %v1175_v42 = vadd.f32 %v1174_v62, %v1173_v7  ;;  %v1180_v50 = vrot.slane %v1179_v33, 1  ;;  %v1292_v4 = vsel %vm1291_vm8, %v1288_v31, %v1290_v30 }
 0x10b   : > { %v1214_v57 = vrot.slane %v1213_v21, 2  ;;  %v1220_v59 = vrot.slane %v1219_v22, 2  ;;  %v1254_v11 = vrot.slane %v1252_v34, 4  ;;  %v1260_v56 = vrot.slane %v1253_v9, 4 }
 0x10c   : > { %v1156_v46 = vrot.slane %v1149_v16, %v1910_v44  ;;  %v1181_v12 = vadd.f32 %v1180_v50, %v1179_v33  ;;  %v1293_v60 = vsel %vm1291_vm8, %v1290_v30, %v1288_v31  ;;  %v1294_v61 = vmul.f32 %v2208_v29, %v1292_v4 }
 0x10d   : > { %v1215_v52 = vadd.f32 %v1214_v57, %v1213_v21  ;;  %v1221_v53 = vadd.f32 %v1220_v59, %v1219_v22  ;;  %v1255_v58 = vadd.f32 %v1254_v11, %v1252_v34  ;;  %v1261_v43 = vadd.f32 %v1260_v56, %v1253_v9 }
 0x10e   : > { %1159 = vst.msk [vmem:[#allocation2 + $0x23] ss:$8 sm:$0x3] %vm1916_vm0, %v1156_v46  ;;  %v1184_v5 = vcombine.low %v1175_v42, %v1181_v12  ;;  %v2251_v36 = vfloor.f32 %v155_v47  ;;  %v1295_v41 = vmul.f32 %v2214_v0, %v1293_v60  ;;  %v1296_v23 = vrot.slane %v1294_v61, 4 }
 0x10f   : > { %v1216_v24 = vrot.slane %v1215_v52, 1  ;;  %v1222_v7 = vrot.slane %v1221_v53, 1  ;;  %v1256_v19 = vrot.slane %v1255_v58, 2  ;;  %v1262_v20 = vrot.slane %v1261_v43, 2 }
 0x110   : > { %vm197_vm9 = vcmp.ge.f32.partialorder %v1985_v37, 0.0  ;;  %vm205_vm10 = vcmp.lt.f32.partialorder %v1985_v37, 16.0  ;;  %v1191_v25 = vrot.slane %v1184_v5, %v1910_v44  ;;  %v1297_v35 = vadd.f32 %v1296_v23, %v1294_v61 }
 0x111   : > { %v1302_v14 = vrot.slane %v1295_v41, 4  ;;  %v152_v30 = vadd.f32 0.5, %v2231_v2  ;;  %vm198_vm11 = vcmp.ge.f32.partialorder %v1989_v39, 0.0  ;;  %vm206_vm12 = vcmp.lt.f32.partialorder %v1989_v39, 16.0  ;;  %vm2303_vm2 = vmand %vm197_vm9, %vm205_vm10 }
 0x112   : > { %v1217_v47 = vadd.f32 %v1216_v24, %v1215_v52  ;;  %v1223_v31 = vadd.f32 %v1222_v7, %v1221_v53  ;;  %v1257_v32 = vadd.f32 %v1256_v19, %v1255_v58  ;;  %v1263_v62 = vadd.f32 %v1262_v20, %v1261_v43  ;;  %v1332_v58 = vpop.permute.xlu1 %1331  ;;  %v1330_v43 = vpop.permute.xlu0 %1329  ;;  %vm2316_vm3 = vmand %vm198_vm11, %vm206_vm12 }
 0x113   : > { %v2262_v33 = vadd.f32 %v1975_v27, %v1998_v54  ;;  %v1198_v45 = vrot.slane %v1191_v25, %v1910_v44  ;;  %v1298_v21 = vrot.slane %v1297_v35, 2  ;;  %v1303_v22 = vadd.f32 %v1302_v14, %v1295_v41 }
 0x114   : > { %v2267_v34 = vsub.f32 %v1955_v10, %v2137_v3  ;;  %v1226_v9 = vcombine.low %v1217_v47, %v1223_v31  ;;  %v1258_v16 = vrot.slane %v1257_v32, 1  ;;  %v1264_v42 = vrot.slane %v1263_v62, 1 }
 0x115   : > { %v2270_v50 = vadd.f32 -2.0, %v2006_v63  ;;  %1201 = vst.msk [vmem:[#allocation2 + $0x24] ss:$8 sm:$0x3] %vm1916_vm0, %v1198_v45  ;;  %v1299_v4 = vadd.f32 %v1298_v21, %v1297_v35  ;;  %v1304_v57 = vrot.slane %v1303_v22, 2  ;;  %v163_v12 = vmul.f32 5.0, %v2251_v36 }
 0x116   : > { %v156_v59 = vmul.f32 0.2, %v152_v30  ;;  %v1233_v11 = vrot.slane %v1226_v9, %v1910_v44  ;;  %v1259_v56 = vadd.f32 %v1258_v16, %v1257_v32  ;;  %v1265_v46 = vadd.f32 %v1264_v42, %v1263_v62 }
 0x117   : > { %vm229_vm13 = vcmp.ge.f32.partialorder %v2002_v55, 0.0  ;;  %vm230_vm14 = vcmp.ge.f32.partialorder %v2262_v33, 0.0  ;;  %v1300_v3 = vrot.slane %v1299_v4, 1  ;;  %v1305_v60 = vadd.f32 %v1304_v57, %v1303_v22 }
 0x118   : > { %v2279_v61 = vadd.f32 -2.0, %v2267_v34  ;;  %v1240_v52 = vrot.slane %v1233_v11, %v1910_v44  ;;  %v1268_v53 = vcombine.low %v1259_v56, %v1265_v46  ;;  %vm1333_vm15 = vcmp.lt.s32.totalorder %v1939_v51, 94  ;;  %vm2332_vm6 = vmand %vm2303_vm2, %vm229_vm13  ;;  %v1371_v11 = vld [vmem:[#allocation2] sm:$0xff] }
 0x119   : > { %v191_v5 = vadd.f32 %v2270_v50, %v1952_v6  ;;  %v1301_v41 = vadd.f32 %v1300_v3, %v1299_v4  ;;  %v1306_v23 = vrot.slane %v1305_v60, 1  ;;  %v2285_v24 = vfloor.f32 %v156_v59  ;;  %vm2343_vm9 = vmand %vm2316_vm3, %vm230_vm14  ;;  %v1373_v3 = vld [vmem:[#allocation2 + $0x10] sm:$0xff] }
 0x11a   : > { %vm245_vm1 = vcmp.lt.f32.partialorder %v2002_v55, 16.0  ;;  %v192_v7 = vadd.f32 %v2270_v50, %v1957_v13  ;;  %1243 = vst.msk [vmem:[#allocation2 + $0x25] ss:$8 sm:$0x3] %vm1916_vm0, %v1240_v52  ;;  %v1275_v19 = vrot.slane %v1268_v53, %v1910_v44  ;;  %v2294_v51 = vsub.f32 %v2126_v8, %v163_v12 }
 0x11b   : > { %v2297_v20 = vadd.f32 -2.0, %v2251_v36  ;;  %v1307_v25 = vadd.f32 %v1306_v23, %v1305_v60  ;;  %v1334_v35 = vsel %vm1333_vm15, %v1330_v43, %v1332_v58  ;;  %v1335_v14 = vsel %vm1333_vm15, %v1332_v58, %v1330_v43  ;;  %vm2373_vm15 = vmand %vm2332_vm6, %vm245_vm1 }
 0x11c   : > { %v223_v47 = vadd.f32 %v2279_v61, %v1972_v26  ;;  %v1282_v31 = vrot.slane %v1275_v19, %v1910_v44  ;;  %v1336_v32 = vmul.f32 %v2208_v29, %v1334_v35  ;;  %v1337_v62 = vmul.f32 %v2214_v0, %v1335_v14 }
 0x11d   : > { %vm199_vm4 = vcmp.ge.f32.partialorder %v191_v5, 0.0  ;;  %v224_v37 = vadd.f32 %v2279_v61, %v1998_v54  ;;  %v1310_v21 = vcombine.low %v1301_v41, %v1307_v25  ;;  %v164_v22 = vmul.f32 5.0, %v2285_v24 }
 0x11e   : > { %vm207_vm5 = vcmp.lt.f32.partialorder %v191_v5, 16.0  ;;  %1285 = vst.msk [vmem:[#allocation2 + $0x26] ss:$8 sm:$0x3] %vm1916_vm0, %v1282_v31  ;;  %v2326_v29 = vadd.f32 -2.0, %v2294_v51  ;;  %v1338_v0 = vrot.slane %v1336_v32, 4  ;;  %v193_v16 = vadd.f32 %v2297_v20, %v1952_v6 }
 0x11f   : > { %v1344_v39 = vrot.slane %v1337_v62, 4  ;;  %vm200_vm7 = vcmp.ge.f32.partialorder %v192_v7, 0.0  ;;  %vm208_vm8 = vcmp.lt.f32.partialorder %v192_v7, 16.0  ;;  %v1317_v42 = vrot.slane %v1310_v21, %v1910_v44  ;;  %vm2350_vm12 = vmand %vm199_vm4, %vm207_vm5 }
 0x120   : > { %vm246_vm10 = vcmp.lt.f32.partialorder %v2262_v33, 16.0  ;;  %vm231_vm11 = vcmp.ge.f32.partialorder %v223_v47, 0.0  ;;  %v1339_v57 = vadd.f32 %v1338_v0, %v1336_v32  ;;  %vm232_vm13 = vcmp.ge.f32.partialorder %v224_v37, 0.0  ;;  %vm2360_vm14 = vmand %vm200_vm7, %vm208_vm8 }
 0x121   : > { %v1345_v59 = vadd.f32 %v1344_v39, %v1337_v62  ;;  %v194_v56 = vadd.f32 %v2297_v20, %v1957_v13  ;;  %v1324_v46 = vrot.slane %v1317_v42, %v1910_v44  ;;  %v2358_v12 = vsub.f32 %v2231_v2, %v164_v22  ;;  %vm2381_vm2 = vmand %vm2343_vm9, %vm246_vm10 }
 0x122   : > { %v225_v60 = vadd.f32 %v2326_v29, %v1972_v26  ;;  %v2367_v52 = vadd.f32 -2.0, %v2285_v24  ;;  %v1340_v53 = vrot.slane %v1339_v57, 2  ;;  %v2655_v5 = vmov 0  ;;  %vm2392_vm1 = vmand %vm2350_vm12, %vm231_vm11 }
 0x123   : > { %v1346_v58 = vrot.slane %v1345_v59, 2  ;;  %v2656_v5 = vsel %vm2381_vm2, 4294967295, %v2655_v5  ;;  %v301_v41 = vmax.f32 %v1977_v28, 1e-24  ;;  %v302_v23 = vmax.f32 %v1991_v40, 1e-24  ;;  %vm2401_vm6 = vmand %vm2360_vm14, %vm232_vm13 }
 0x124   : > { %vm201_vm3 = vcmp.ge.f32.partialorder %v193_v16, 0.0  ;;  %vm209_vm4 = vcmp.lt.f32.partialorder %v193_v16, 16.0  ;;  %1327 = vst.msk [vmem:[#allocation2 + $0x27] ss:$8 sm:$0x3] %vm1916_vm0, %v1324_v46  ;;  %vm247_vm5 = vcmp.lt.f32.partialorder %v223_v47, 16.0  ;;  %v226_v33 = vadd.f32 %v2326_v29, %v1998_v54 }
 0x125   : > { %v1341_v7 = vadd.f32 %v1340_v53, %v1339_v57  ;;  %v1347_v28 = vadd.f32 %v1346_v58, %v1345_v59  ;;  %vm202_vm7 = vcmp.ge.f32.partialorder %v194_v56, 0.0  ;;  %vm210_vm8 = vcmp.lt.f32.partialorder %v194_v56, 16.0  ;;  %vm217_vm9 = vmand %vm201_vm3, %vm209_vm4  ;;  %v1372_v56 = vld [vmem:[#allocation2 + $0x8] sm:$0xff] }
 0x126   : > { %v2406_v19 = vadd.f32 -2.0, %v2358_v12  ;;  %vm233_vm10 = vcmp.ge.f32.partialorder %v225_v60, 0.0  ;;  %v195_v25 = vadd.f32 %v2367_v52, %v1952_v6  ;;  %1762 = vrsqrt.f32 %v301_v41  ;;  %vm2413_vm12 = vmand %vm2392_vm1, %vm247_vm5 }
 0x127   : > { %v1342_v35 = vrot.slane %v1341_v7, 1  ;;  %v1348_v14 = vrot.slane %v1347_v28, 1  ;;  %vm248_vm11 = vcmp.lt.f32.partialorder %v224_v37, 16.0  ;;  %v2661_v30 = vmov 0  ;;  %vm218_vm13 = vmand %vm202_vm7, %vm210_vm8 }
 0x128   : > { %v2662_v30 = vsel %vm2413_vm12, 4294967295, %v2661_v30  ;;  %v196_v31 = vadd.f32 %v2367_v52, %v1957_v13  ;;  %1764 = vrsqrt.f32 %v302_v23  ;;  %vm234_vm14 = vcmp.ge.f32.partialorder %v226_v33, 0.0  ;;  %vm241_vm3 = vmand %vm217_vm9, %vm233_vm10 }
 0x129   : > { %v1343_v32 = vadd.f32 %v1342_v35, %v1341_v7  ;;  %v1349_v62 = vadd.f32 %v1348_v14, %v1347_v28  ;;  %vm249_vm4 = vcmp.lt.f32.partialorder %v225_v60, 16.0  ;;  %v227_v6 = vadd.f32 %v2406_v19, %v1972_v26  ;;  %vm2423_vm0 = vmand %vm2401_vm6, %vm248_vm11  ;;  %v1374_v60 = vld [vmem:[#allocation2 + $0x18] sm:$0xff] }
 0x12a   : > { %v2663_v47 = vmov 0  ;;  %vm203_vm1 = vcmp.ge.f32.partialorder %v195_v25, 0.0  ;;  %vm211_vm5 = vcmp.lt.f32.partialorder %v195_v25, 16.0  ;;  %v228_v13 = vadd.f32 %v2406_v19, %v1998_v54  ;;  %vm2430_vm8 = vmand %vm218_vm13, %vm234_vm14 }
 0x12b   : > { %v2664_v47 = vsel %vm2423_vm0, 4294967295, %v2663_v47  ;;  %v1352_v45 = vcombine.low %v1343_v32, %v1349_v62  ;;  %vm2638_vm7 = vcmp.lt.f32.partialorder %v1935_v49, 25.0  ;;  %vm204_vm9 = vcmp.ge.f32.partialorder %v196_v31, 0.0  ;;  %vm2435_vm11 = vmand %vm241_vm3, %vm249_vm4  ;;  %v1375_v4 = vld [vmem:[#allocation2 + $0x20] sm:$0xff]  ;;  %v1376_v57 = vld [vmem:[#allocation2 + $0x28] sm:$0xff] }
 0x12c   : > { %vm212_vm10 = vcmp.lt.f32.partialorder %v196_v31, 16.0  ;;  %vm250_vm6 = vcmp.lt.f32.partialorder %v226_v33, 16.0  ;;  %v2667_v26 = vmov 0  ;;  %vm219_vm0 = vmand %vm203_vm1, %vm211_vm5  ;;  %vm235_vm2 = vcmp.ge.f32.partialorder %v227_v6, 0.0 }
 0x12d   : > { %v2668_v26 = vsel %vm2435_vm11, 4294967295, %v2667_v26  ;;  %v1359_v21 = vrot.slane %v1352_v45, %v1910_v44  ;;  %vm2444_vm13 = vmand %vm2373_vm15, %vm2638_vm7  ;;  %v2669_v54 = vmov 0  ;;  %vm2671_vm14 = vnez %v2656_v5 }
 0x12e   : > { %v2670_v54 = vsel %vm2444_vm13, 4294967295, %v2669_v54  ;;  %vm2452_vm3 = vmand %vm2671_vm14, %vm2638_vm7  ;;  %vm236_vm12 = vcmp.ge.f32.partialorder %v228_v13, 0.0  ;;  %vm2674_vm1 = vcmp.lt.f32.partialorder %v1955_v10, 25.0  ;;  %vm2675_vm5 = vnez %v2662_v30 }
 0x12f   : > { %vm220_vm4 = vmand %vm204_vm9, %vm212_vm10  ;;  %v1366_v0 = vrot.slane %v1359_v21, %v1910_v44  ;;  %vm2679_vm11 = vnez %v2664_v47  ;;  %vm179_vm9 = vcmp.lt.f32.partialorder %v2126_v8, 25.0  ;;  %vm2686_vm7 = vnez %v2640_v48 }
 0x130   : > { %vm2461_vm15 = vmand %vm2675_vm5, %vm2674_vm1  ;;  %vm251_vm5 = vcmp.lt.f32.partialorder %v227_v6, 16.0  ;;  %v1763_v42 = vpop.eup %1762  ;;  %v1822_v5 = vmov -1e+30  }
 0x131   : > { %vm2678_vm13 = vmmov %vm2674_vm1  ;;  %1369 = vst.msk [vmem:[#allocation2 + $0x30] ss:$8 sm:$0x3] %vm2686_vm7, %v1366_v0  ;;  %v1383_v48 = vmul.f32 %v1763_v42, %v1375_v4  ;;  %v1379_v58 = vmul.f32 %v1763_v42, %v1371_v11  ;;  %v271_v41 = vsel %vm179_vm9, 0.0, %v1822_v5  ;;  %v1381_v55 = vmul.f32 %v1763_v42, %v1373_v3 }
 0x132   : > { %vm2469_vm14 = vmand %vm2679_vm11, %vm2678_vm13  ;;  %vm252_vm13 = vcmp.lt.f32.partialorder %v228_v13, 16.0  ;;  %v1765_v59 = vpop.eup %1764 }
 0x133   : > { %vm2476_vm10 = vmand %vm2430_vm8, %vm250_vm6  ;;  %vm2687_vm8 = vnez %v2668_v26  ;;  %v1384_v53 = vmul.f32 %v1765_v59, %v1376_v57  ;;  %v1380_v43 = vmul.f32 %v1765_v59, %v1372_v56  ;;  %v1382_v33 = vmul.f32 %v1765_v59, %v1374_v60 }
 0x134   : > { %vm2480_vm1 = vmand %vm219_vm0, %vm235_vm2  ;;  %vm180_vm2 = vcmp.lt.f32.partialorder %v2231_v2, 25.0 }
 0x135   : > { %vm244_vm11 = vmand %vm220_vm4, %vm236_vm12  ;;  %vm2690_vm4 = vcmp.lt.f32.partialorder %v1935_v49, 25.0  ;;  %v272_v28 = vsel %vm180_vm2, 0.0, %v1822_v5 }
 0x136   : > { %vm2490_vm0 = vmand %vm2687_vm8, %vm179_vm9  ;;  %v269_v23 = vsel %vm2690_vm4, 0.0, %v1822_v5 }
 0x137   : > { %vm259_vm7 = vmand %vm2480_vm1, %vm251_vm5  ;;  %vm2691_vm5 = vcmp.lt.f32.partialorder %v1955_v10, 25.0  ;;  %v2515_v35 = vsel %vm2490_vm0, %v1383_v48, %v271_v41  ;;  %v2525_v62 = vsel %vm2452_vm3, %v1380_v43, %v269_v23 }
 0x138   : > { %vm260_vm12 = vmand %vm244_vm11, %vm252_vm13  ;;  %v270_v7 = vsel %vm2691_vm5, 0.0, %v1822_v5  ;;  %v1377_v40 = vld [vmem:[#allocation2 + $0x30] sm:$0xff]  ;;  %v1378_v25 = vld [vmem:[#allocation2 + $0x38] sm:$0xff] }
 0x139   : > { %vm266_vm6 = vmand %vm2476_vm10, %vm179_vm9  ;;  %v1385_v30 = vmul.f32 %v1763_v42, %v1377_v40  ;;  %v1386_v31 = vmul.f32 %v1765_v59, %v1378_v25  ;;  %vm2692_vm10 = vnez %v2670_v54  ;;  %v2529_v6 = vsel %vm2461_vm15, %v1381_v55, %v270_v7 }
 0x13a   : > { %vm267_vm1 = vmand %vm259_vm7, %vm180_vm2  ;;  %v2517_v14 = vsel %vm266_vm6, %v1384_v53, %v271_v41  ;;  %v2521_v32 = vsel %vm2692_vm10, %v1379_v58, %v269_v23  ;;  %v2533_v47 = vsel %vm2469_vm14, %v1382_v33, %v270_v7 }
 0x13b   : > { %vm268_vm11 = vmand %vm260_vm12, %vm180_vm2  ;;  %v2535_v13 = vsel %vm267_vm1, %v1385_v30, %v272_v28  ;;  %v1395_v37 = vmax.f32 %v2521_v32, %v2515_v35  ;;  %v1404_v26 = vmax.f32 %v2525_v62, %v2517_v14 }
 0x13c   : > { %v2537_v45 = vsel %vm268_vm11, %v1386_v31, %v272_v28  ;;  %v1396_v21 = vmax.f32 %v2529_v6, %v2535_v13  ;;  %vm2693_vm6 = vmmov %vm2690_vm4 }
 0x13d   : > { %v1405_v54 = vmax.f32 %v2533_v47, %v2537_v45  ;;  %vm2694_vm4 = vmmov %vm2691_vm5 }
 0x13e   : > { %v1397_v22 = vmax.f32 %v1395_v37, %v1396_v21 }
 0x13f   : > { %v1406_v0 = vmax.f32 %v1404_v26, %v1405_v54 }
 0x140   : > { %v1398_v39 = vrot.slane %v1397_v22, 4 }
 0x141   : > { %v1407_v9 = vrot.slane %v1406_v0, 4 }
 0x142   : > { %v1399_v44 = vmax.f32 %v1397_v22, %v1398_v39 }
 0x143   : > { %v1408_v16 = vmax.f32 %v1406_v0, %v1407_v9 }
 0x144   : > { %v1400_v42 = vrot.slane %v1399_v44, 2 }
 0x145   : > { %v1409_v4 = vrot.slane %v1408_v16, 2 }
 0x146   : > { %v1401_v57 = vmax.f32 %v1399_v44, %v1400_v42 }
 0x147   : > { %v1410_v59 = vmax.f32 %v1408_v16, %v1409_v4 }
 0x148   : > { %v1402_v11 = vrot.slane %v1401_v57, 1 }
 0x149   : > { %v1411_v56 = vrot.slane %v1410_v59, 1 }
 0x14a   : > { %v2547_v46 = vmax.f32 %v1401_v57, %v1402_v11 }
 0x14b   : > { %v2549_v3 = vmax.f32 %v1410_v59, %v1411_v56 }
 0x14c   : > { %vm1413_vm3 = vcmp.eq.f32.partialorder %v2521_v32, %v2547_v46  ;;  %vm1415_vm14 = vcmp.eq.f32.partialorder %v2529_v6, %v2547_v46  ;;  %vm1417_vm8 = vcmp.eq.f32.partialorder %v2515_v35, %v2547_v46  ;;  %vm1419_vm7 = vcmp.eq.f32.partialorder %v2535_v13, %v2547_v46 }
 0x14d   : > { %vm1414_vm15 = vcmp.eq.f32.partialorder %v2525_v62, %v2549_v3  ;;  %vm1416_vm13 = vcmp.eq.f32.partialorder %v2533_v47, %v2549_v3  ;;  %vm1418_vm0 = vcmp.eq.f32.partialorder %v2517_v14, %v2549_v3  ;;  %vm1420_vm12 = vcmp.eq.f32.partialorder %v2537_v45, %v2549_v3 }
 0x14e   : > { %v1421_v60 = vsel %vm1413_vm3, %v1935_v49, 32.0  ;;  %v1422_v48 = vsel %vm1414_vm15, %v1935_v49, 32.0  ;;  %v1423_v53 = vsel %vm1415_vm14, %v1955_v10, 32.0  ;;  %v1424_v58 = vsel %vm1416_vm13, %v1955_v10, 32.0 }
 0x14f   : > { %v1425_v43 = vsel %vm1417_vm8, %v2126_v8, 32.0  ;;  %v1426_v5 = vsel %vm1418_vm0, %v2126_v8, 32.0  ;;  %v1427_v41 = vsel %vm1419_vm7, %v2231_v2, 32.0  ;;  %v1428_v23 = vsel %vm1420_vm12, %v2231_v2, 32.0 }
 0x150   : > { %v1429_v55 = vmin.f32 %v1421_v60, %v1425_v43  ;;  %v1430_v33 = vmin.f32 %v1423_v53, %v1427_v41  ;;  %v1438_v7 = vmin.f32 %v1422_v48, %v1426_v5  ;;  %v1439_v28 = vmin.f32 %v1424_v58, %v1428_v23 }
 0x151   : > { %v1715_v49 = vsel %vm180_vm2, 1.0, %v1796_v18  ;;  %vm1619_vm2 = vcmp.eq.s32.totalorder %v1905_v38, 0 }
 0x152   : > { %v1431_v40 = vmin.f32 %v1429_v55, %v1430_v33  ;;  %v1440_v25 = vmin.f32 %v1438_v7, %v1439_v28 }
 0x154   : > { %v1432_v30 = vrot.slane %v1431_v40, 4  ;;  %v1441_v31 = vrot.slane %v1440_v25, 4 }
 0x156   : > { %v1433_v37 = vmin.f32 %v1431_v40, %v1432_v30  ;;  %v1442_v26 = vmin.f32 %v1440_v25, %v1441_v31 }
 0x158   : > { %v1434_v21 = vrot.slane %v1433_v37, 2  ;;  %v1443_v54 = vrot.slane %v1442_v26, 2 }
 0x15a   : > { %v1435_v22 = vmin.f32 %v1433_v37, %v1434_v21  ;;  %v1444_v0 = vmin.f32 %v1442_v26, %v1443_v54 }
 0x15c   : > { %v1436_v39 = vrot.slane %v1435_v22, 1  ;;  %v1445_v9 = vrot.slane %v1444_v0, 1 }
 0x15e   : > { %v1437_v44 = vmin.f32 %v1435_v22, %v1436_v39  ;;  %v1446_v16 = vmin.f32 %v1444_v0, %v1445_v9 }
 0x160   : > { %v1447_v42 = vadd.f32 0.5, %v1437_v44  ;;  %v1448_v4 = vadd.f32 0.5, %v1446_v16 }
 0x162   : > { %v1449_v57 = vmul.f32 0.2, %v1447_v42  ;;  %v1450_v59 = vmul.f32 0.2, %v1448_v4 }
 0x164   : > { %v1451_v11 = vfloor.f32 %v1449_v57  ;;  %v1452_v56 = vfloor.f32 %v1450_v59 }
 0x166   : > { %v1453_v60 = vmul.f32 5.0, %v1451_v11  ;;  %v1454_v48 = vmul.f32 5.0, %v1452_v56  ;;  %v1457_v53 = vsub.f32 %v1949_v1, %v1451_v11  ;;  %v1458_v58 = vsub.f32 %v1949_v1, %v1452_v56 }
 0x167   : > { %v1459_v43 = vsub.f32 %v2006_v63, %v1451_v11  ;;  %v1460_v5 = vsub.f32 %v2006_v63, %v1452_v56  ;;  %v1461_v41 = vsub.f32 %v2251_v36, %v1451_v11  ;;  %v1462_v23 = vsub.f32 %v2251_v36, %v1452_v56 }
 0x168   : > { %v1455_v55 = vsub.f32 %v1437_v44, %v1453_v60  ;;  %v1456_v33 = vsub.f32 %v1446_v16, %v1454_v48  ;;  %v1463_v7 = vsub.f32 %v2285_v24, %v1451_v11  ;;  %v1464_v28 = vsub.f32 %v2285_v24, %v1452_v56 }
 0x169   : > { %v1465_v40 = vmul.f32 %v1457_v53, %v1457_v53  ;;  %v1466_v25 = vmul.f32 %v1458_v58, %v1458_v58  ;;  %v1467_v30 = vmul.f32 %v1459_v43, %v1459_v43  ;;  %v1468_v31 = vmul.f32 %v1460_v5, %v1460_v5 }
 0x16a   : > { %v1469_v37 = vmul.f32 %v1461_v41, %v1461_v41  ;;  %v1470_v1 = vmul.f32 %v1462_v23, %v1462_v23  ;;  %v1471_v26 = vmul.f32 %v1463_v7, %v1463_v7  ;;  %v1472_v21 = vmul.f32 %v1464_v28, %v1464_v28 }
 0x16b   : > { %v1473_v63 = vsub.f32 %v1961_v15, %v1455_v55  ;;  %v1474_v54 = vsub.f32 %v1961_v15, %v1456_v33  ;;  %v1475_v36 = vsub.f32 %v2267_v34, %v1455_v55  ;;  %v1476_v22 = vsub.f32 %v2267_v34, %v1456_v33 }
 0x16c   : > { %v1477_v0 = vsub.f32 %v2294_v51, %v1455_v55  ;;  %v1478_v24 = vsub.f32 %v2294_v51, %v1456_v33  ;;  %v1479_v39 = vsub.f32 %v2358_v12, %v1455_v55  ;;  %v1480_v9 = vsub.f32 %v2358_v12, %v1456_v33 }
 0x16d   : > { %v1481_v44 = vmul.f32 %v1473_v63, %v1473_v63  ;;  %v1482_v16 = vmul.f32 %v1474_v54, %v1474_v54  ;;  %v1483_v42 = vmul.f32 %v1475_v36, %v1475_v36  ;;  %v1484_v4 = vmul.f32 %v1476_v22, %v1476_v22 }
 0x16e   : > { %v1485_v57 = vmul.f32 %v1477_v0, %v1477_v0  ;;  %v1486_v59 = vmul.f32 %v1478_v24, %v1478_v24  ;;  %v1487_v11 = vmul.f32 %v1479_v39, %v1479_v39  ;;  %v1488_v15 = vmul.f32 %v1480_v9, %v1480_v9 }
 0x16f   : > { %v1489_v56 = vadd.f32 %v1481_v44, %v1465_v40  ;;  %v1490_v60 = vadd.f32 %v1482_v16, %v1466_v25  ;;  %v1491_v48 = vadd.f32 %v1483_v42, %v1467_v30  ;;  %v1492_v34 = vadd.f32 %v1484_v4, %v1468_v31 }
 0x170   : > { %v1493_v53 = vadd.f32 %v1485_v57, %v1469_v37  ;;  %v1494_v58 = vadd.f32 %v1486_v59, %v1470_v1  ;;  %v1495_v43 = vadd.f32 %v1487_v11, %v1471_v26  ;;  %v1496_v51 = vadd.f32 %v1488_v15, %v1472_v21 }
 0x171   : > { %v1497_v5 = vsub.f32 0.0, %v1489_v56  ;;  %v1498_v41 = vsub.f32 0.0, %v1490_v60  ;;  %v1499_v23 = vsub.f32 0.0, %v1491_v48  ;;  %v1500_v12 = vsub.f32 0.0, %v1492_v34 }
 0x172   : > { %v1501_v55 = vsub.f32 0.0, %v1493_v53  ;;  %v1502_v33 = vsub.f32 0.0, %v1494_v58  ;;  %v1503_v7 = vsub.f32 0.0, %v1495_v43  ;;  %v1504_v28 = vsub.f32 0.0, %v1496_v51 }
 0x173   : > { %v1505_v63 = vmul.f32 50.0, %v1497_v5  ;;  %v1506_v54 = vmul.f32 50.0, %v1498_v41  ;;  %v1507_v36 = vmul.f32 50.0, %v1499_v23  ;;  %v1508_v22 = vmul.f32 50.0, %v1500_v12 }
 0x174   : > { %v1509_v40 = vmul.f32 50.0, %v1501_v55  ;;  %v1510_v25 = vmul.f32 50.0, %v1502_v33  ;;  %v1511_v30 = vmul.f32 50.0, %v1503_v7  ;;  %v1512_v26 = vmul.f32 50.0, %v1504_v28 }
 0x175   : > { %v1513_v31 = vmul.f32 1.442695, %v1505_v63  ;;  %v1515_v37 = vmul.f32 1.442695, %v1506_v54  ;;  %v1517_v1 = vmul.f32 1.442695, %v1507_v36 }
 0x176   : > { %v1519_v21 = vmul.f32 1.442695, %v1508_v22  ;;  %v1521_v0 = vmul.f32 1.442695, %v1509_v40  ;;  %v1523_v24 = vmul.f32 1.442695, %v1510_v25 }
 0x177   : > { %1766 = vpow2.f32 %v1513_v31  ;;  %v1525_v39 = vmul.f32 1.442695, %v1511_v30  ;;  %v1527_v9 = vmul.f32 1.442695, %v1512_v26  ;;  %v1712_v44 = vsel %vm2693_vm6, 1.0, %v1796_v18 }
 0x178   : > { %1768 = vpow2.f32 %v1515_v37  ;;  %v1713_v42 = vsel %vm2694_vm4, 1.0, %v1796_v18  ;;  %v1714_v11 = vsel %vm179_vm9, 1.0, %v1796_v18  ;;  %vm1622_vm9 = vcmp.eq.s32.totalorder %v1905_v38, 1 }
 0x179   : > { %1770 = vpow2.f32 %v1517_v1 }
 0x17a   : > { %1772 = vpow2.f32 %v1519_v21 }
 0x17b   : > { %1774 = vpow2.f32 %v1521_v0 }
 0x17c   : > { %1776 = vpow2.f32 %v1523_v24 }
 0x17d   : > { %1778 = vpow2.f32 %v1525_v39 }
 0x17e   : > { %1780 = vpow2.f32 %v1527_v9 }
 0x181   : > { %v1767_v16 = vpop.eup %1766 }
 0x182   : > { %v1769_v4 = vpop.eup %1768  ;;  %v1529_v57 = vmul.f32 %v1767_v16, %v1712_v44 }
 0x183   : > { %v1771_v59 = vpop.eup %1770  ;;  %v1530_v15 = vmul.f32 %v1769_v4, %v1712_v44 }
 0x184   : > { %v1773_v56 = vpop.eup %1772  ;;  %v1531_v60 = vmul.f32 %v1771_v59, %v1713_v42  ;;  %v1537_v48 = vmul.f32 %v1529_v57, %v2521_v32 }
 0x185   : > { %v1775_v34 = vpop.eup %1774  ;;  %v1532_v53 = vmul.f32 %v1773_v56, %v1713_v42  ;;  %v1538_v10 = vmul.f32 %v1530_v15, %v2525_v62 }
 0x186   : > { %v1777_v58 = vpop.eup %1776  ;;  %v1533_v43 = vmul.f32 %v1775_v34, %v1714_v11  ;;  %v1539_v51 = vmul.f32 %v1531_v60, %v2529_v6  ;;  %v1563_v8 = vmul.f32 %v1968_v17, %v1537_v48  ;;  %v1589_v5 = vmul.f32 %v1975_v27, %v1537_v48 }
 0x187   : > { %v1779_v41 = vpop.eup %1778  ;;  %v1534_v23 = vmul.f32 %v1777_v58, %v1714_v11  ;;  %v1540_v32 = vmul.f32 %v1532_v53, %v2533_v47  ;;  %v1564_v12 = vmul.f32 %v1968_v17, %v1538_v10  ;;  %v1590_v2 = vmul.f32 %v1975_v27, %v1538_v10 }
 0x188   : > { %v1781_v18 = vpop.eup %1780  ;;  %v1535_v55 = vmul.f32 %v1779_v41, %v1715_v49  ;;  %v1541_v62 = vmul.f32 %v1533_v43, %v2515_v35  ;;  %v1545_v33 = vadd.f32 %v1539_v51, %v1537_v48  ;;  %v1565_v7 = vmul.f32 %v2270_v50, %v1539_v51 }
 0x189   : > { %v1536_v6 = vmul.f32 %v1781_v18, %v1715_v49  ;;  %v1542_v28 = vmul.f32 %v1534_v23, %v2517_v14  ;;  %v1554_v63 = vadd.f32 %v1540_v32, %v1538_v10  ;;  %v1566_v54 = vmul.f32 %v2270_v50, %v1540_v32 }
 0x18a   : > { %v1543_v36 = vmul.f32 %v1535_v55, %v2535_v13  ;;  %v1546_v47 = vadd.f32 %v1545_v33, %v1541_v62  ;;  %v1567_v17 = vmul.f32 %v2297_v20, %v1541_v62  ;;  %v1571_v22 = vadd.f32 %v1565_v7, %v1563_v8 }
 0x18b   : > { %v1544_v27 = vmul.f32 %v1536_v6, %v2537_v45  ;;  %v1555_v40 = vadd.f32 %v1554_v63, %v1542_v28  ;;  %v1568_v35 = vmul.f32 %v2297_v20, %v1542_v28  ;;  %v1580_v25 = vadd.f32 %v1566_v54, %v1564_v12 }
 0x18c   : > { %v1547_v30 = vadd.f32 %v1546_v47, %v1543_v36  ;;  %v1569_v31 = vmul.f32 %v2367_v52, %v1543_v36  ;;  %v1572_v37 = vadd.f32 %v1571_v22, %v1567_v17  ;;  %v1591_v14 = vmul.f32 %v2279_v61, %v1539_v51 }
 0x18d   : > { %v1556_v1 = vadd.f32 %v1555_v40, %v1544_v27  ;;  %v1570_v50 = vmul.f32 %v2367_v52, %v1544_v27  ;;  %v1581_v13 = vadd.f32 %v1580_v25, %v1568_v35  ;;  %v1592_v26 = vmul.f32 %v2279_v61, %v1540_v32 }
 0x18e   : > { %v1548_v21 = vrot.slane %v1547_v30, 4  ;;  %v1573_v0 = vadd.f32 %v1572_v37, %v1569_v31  ;;  %v1593_v39 = vmul.f32 %v2326_v29, %v1541_v62  ;;  %v1594_v9 = vmul.f32 %v2326_v29, %v1542_v28 }
 0x18f   : > { %v1557_v24 = vrot.slane %v1556_v1, 4  ;;  %v1582_v45 = vadd.f32 %v1581_v13, %v1570_v50  ;;  %v1597_v44 = vadd.f32 %v1591_v14, %v1589_v5  ;;  %v1606_v16 = vadd.f32 %v1592_v26, %v1590_v2 }
 0x190   : > { %v1549_v20 = vadd.f32 %v1548_v21, %v1547_v30  ;;  %v1574_v4 = vrot.slane %v1573_v0, 4  ;;  %v1595_v57 = vmul.f32 %v2406_v19, %v1543_v36  ;;  %v1596_v52 = vmul.f32 %v2406_v19, %v1544_v27 }
 0x191   : > { %v1558_v42 = vadd.f32 %v1557_v24, %v1556_v1  ;;  %v1583_v11 = vrot.slane %v1582_v45, 4  ;;  %v1598_v61 = vadd.f32 %v1597_v44, %v1593_v39  ;;  %v1607_v15 = vadd.f32 %v1606_v16, %v1594_v9 }
 0x192   : > { %v1550_v59 = vrot.slane %v1549_v20, 2  ;;  %v1575_v53 = vadd.f32 %v1574_v4, %v1573_v0 }
 0x193   : > { %v1559_v56 = vrot.slane %v1558_v42, 2  ;;  %v1599_v48 = vadd.f32 %v1598_v61, %v1595_v57  ;;  %v1608_v34 = vadd.f32 %v1607_v15, %v1596_v52  ;;  %v1584_v29 = vadd.f32 %v1583_v11, %v1582_v45 }
 0x194   : > { %v1551_v60 = vadd.f32 %v1550_v59, %v1549_v20  ;;  %v1576_v19 = vrot.slane %v1575_v53, 2 }
 0x195   : > { %v1560_v49 = vadd.f32 %v1559_v56, %v1558_v42  ;;  %v1600_v58 = vrot.slane %v1599_v48, 4  ;;  %v1609_v43 = vrot.slane %v1608_v34, 4  ;;  %v1585_v32 = vrot.slane %v1584_v29, 2 }
 0x196   : > { %v1552_v10 = vrot.slane %v1551_v60, 1  ;;  %v1577_v62 = vadd.f32 %v1576_v19, %v1575_v53 }
 0x197   : > { %v1561_v51 = vrot.slane %v1560_v49, 1  ;;  %v1601_v5 = vadd.f32 %v1600_v58, %v1599_v48  ;;  %v1610_v41 = vadd.f32 %v1609_v43, %v1608_v34  ;;  %v1586_v7 = vadd.f32 %v1585_v32, %v1584_v29 }
 0x198   : > { %v1553_v8 = vadd.f32 %v1552_v10, %v1551_v60  ;;  %v1578_v28 = vrot.slane %v1577_v62, 1 }
 0x199   : > { %v1562_v23 = vadd.f32 %v1561_v51, %v1560_v49  ;;  %v1602_v12 = vrot.slane %v1601_v5, 2  ;;  %v1611_v2 = vrot.slane %v1610_v41, 2  ;;  %v1587_v54 = vrot.slane %v1586_v7, 1 }
 0x19a   : > { %v1615_v18 = vadd.f32 1e-13, %v1553_v8  ;;  %v1579_v47 = vadd.f32 %v1578_v28, %v1577_v62 }
 0x19b   : > { %v1616_v55 = vadd.f32 1e-13, %v1562_v23  ;;  %v1603_v33 = vadd.f32 %v1602_v12, %v1601_v5  ;;  %v1612_v6 = vadd.f32 %v1611_v2, %v1610_v41  ;;  %v1588_v27 = vadd.f32 %v1587_v54, %v1586_v7 }
 0x19c   : > { %1782 = vrcp.f32 %v1615_v18 }
 0x19d   : > { %1784 = vrcp.f32 %v1616_v55  ;;  %v1604_v63 = vrot.slane %v1603_v33, 1  ;;  %v1613_v36 = vrot.slane %v1612_v6, 1 }
 0x19f   : > { %v1605_v17 = vadd.f32 %v1604_v63, %v1603_v33  ;;  %v1614_v40 = vadd.f32 %v1613_v36, %v1612_v6 }
 0x1a6   : > { %v1783_v22 = vpop.eup %1782 }
 0x1a7   : > { %v1785_v35 = vpop.eup %1784  ;;  %v1620_v25 = vmul.f32 %v1783_v22, %v1579_v47  ;;  %v1623_v30 = vmul.f32 %v1783_v22, %v1605_v17 }
 0x1a8   : > { %v1621_v31 = vmul.f32 %v1785_v35, %v1588_v27  ;;  %v1624_v37 = vmul.f32 %v1785_v35, %v1614_v40 }
 0x1a9   : > { %v1625_v14 = vsel %vm1622_vm9, %v1623_v30, %v2547_v46 }
 0x1aa   : > { %v1626_v1 = vsel %vm1622_vm9, %v1624_v37, %v2549_v3  ;;  %v1627_v50 = vsel %vm1619_vm2, %v1620_v25, %v1625_v14 }
 0x1ab   : > { %v1628_v13 = vsel %vm1619_vm2, %v1621_v31, %v1626_v1 }
 0x1ac   : > { %v1631_v26 = vcombine.low %v1627_v50, %v1628_v13 }
 0x1ae   : > { %1718 = vst [vmem:[%s2019_s14 + $0x8] sm:$0x77] %v1631_v26 }
 0x1af PF: > { %s11_s6 = sadd.s32 1, %s1794_s6  }
 0x1b0   : > { %p8_p4 = scmp.ge.s32.totalorder %s11_s6, 4  }
 0x1b2   :  { %10 = sbr.rel (!%p8_p4) target bundleno = 1 (0x1), region = 80 }

</bundles_post_ra>
